<compile_context>
chip_gen: v6e
topology: v6e:2x2x1
jax: 0.10.0
libtpu: 0.0.40
codegen_flags: <defaults>
</compile_context>

<pallas_src>
import numpy as np
import jax
import jax.numpy as jnp
from jax.experimental import pallas as pl
from jax.experimental.pallas import tpu as pltpu


def _round_up(x, m):
    return ((x + m - 1) // m) * m


# ---------------- kernel 1: Toeplitz-diagonal table builder -----------------
# toe_table[d, ds, dt] = f[(m0 - 1 - d) * tile + p_left + ds - dt]  (0 if OOB)
# so that for output tile jt and input tile k the conv block is
# toe_table[m0 - 1 - k + jt] and y_tile_jt = sum_k u_tile_k @ toe_table[...].

def _make_builder_kernel(L, Lp, tile, p_left, n_modes, eps, d_min, d_max):
    d0p = (Lp - 1) + p_left      # fpad-space index of filter tap 0

    def kernel(params_ref, toe_ref):
        d = pl.program_id(0)
        in_band = jnp.logical_and(d >= d_min, d <= d_max)

        @pl.when(jnp.logical_not(in_band))
        def _zero():                      # diagonals with no filter support
            toe_ref[...] = jnp.zeros_like(toe_ref)

        @pl.when(in_band)
        def _build():
            # (1, 2*tile) window of the reversed/shifted/zero-padded filter.
            lane = jax.lax.broadcasted_iota(jnp.int32, (1, 2 * tile), 1)
            x = d * tile + lane                  # global fpad index
            i = d0p - x                          # filter tap index
            valid = jnp.logical_and(i >= 0, i < L)
            # clip before exp so out-of-range lanes cannot overflow
            t = eps * jnp.clip(i, 0, L - 1).astype(jnp.float32)
            acc = jnp.zeros((1, 2 * tile), jnp.float32)
            for m in range(n_modes):             # static unroll, n_modes tiny
                a = params_ref[0, m]             # scalar reads from SMEM
                wf = params_ref[1, m]
                co = params_ref[2, m]
                acc = acc + co * jnp.exp(a * t) * jnp.cos(wf * t)
            w = jnp.where(valid, acc, 0.0)

            # Shear into the (tile, tile) Toeplitz tile:
            #   toe[ds, dt] = w[0, (tile - 1 - ds) + dt]
            # Static lane slices + sublane concats only; runs once per
            # diagonal (2*m0 - 1 times total), not once per conv grid step.
            for g in range(tile // 8):
                rows = [w[:, tile - 1 - (g * 8 + r): 2 * tile - 1 - (g * 8 + r)]
                        for r in range(8)]
                toe_ref[g * 8:(g + 1) * 8, :] = jnp.concatenate(rows, axis=0)

    return kernel


def _build_toe_table(params, L, Lp, tile, p_left, eps, d_min, d_max):
    n_modes = params.shape[1]
    m0 = Lp // tile
    n_d = 2 * m0 - 1
    n_band = d_max - d_min + 1
    kernel = _make_builder_kernel(L, Lp, tile, p_left, n_modes, eps,
                                  d_min, d_max)
    return pl.pallas_call(
        kernel,
        out_shape=jax.ShapeDtypeStruct((n_d, tile, tile), jnp.float32),
        grid=(n_d,),
        in_specs=[pl.BlockSpec(memory_space=pltpu.MemorySpace.SMEM)],
        out_specs=pl.BlockSpec((None, tile, tile), lambda d: (d, 0, 0)),
        compiler_params=pltpu.CompilerParams(
            dimension_semantics=("parallel",)),
        cost_estimate=pl.CostEstimate(
            flops=6 * n_modes * 2 * tile * n_band,
            transcendentals=2 * n_modes * 2 * tile * n_band,
            bytes_accessed=4 * (n_d * tile * tile + 3 * n_modes)),
    )(params)


# ---------------- kernel 2: banded block-Toeplitz matmul ---------------------

def _make_conv_kernel(tile, m0, nblk, d_min, d_max):
    def kernel(*refs):
        u_ref = refs[0]
        toe_refs = refs[1:1 + nblk]
        y_ref = refs[1 + nblk]
        acc_ref = refs[2 + nblk]

        j = pl.program_id(0)
        k = pl.program_id(1)

        @pl.when(k == 0)
        def _init():
            acc_ref[...] = jnp.zeros_like(acc_ref)

        # u is resident in VMEM (constant index map); tile-aligned lane slice.
        start = pl.multiple_of(k * tile, tile)
        u_blk = u_ref[:, pl.ds(start, tile)]

        for jj in range(nblk):
            d = m0 - 1 - k + j * nblk + jj       # diagonal of this sub-block
            in_band = jnp.logical_and(d >= d_min, d <= d_max)

            def body(jj=jj):                     # skip all-zero diagonals
                acc_ref[:, jj * tile:(jj + 1) * tile] += jnp.dot(
                    u_blk, toe_refs[jj][...],
                    preferred_element_type=jnp.float32)

            pl.when(in_band)(body)

        @pl.when(k == pl.num_programs(1) - 1)
        def _fin():
            y_ref[...] = acc_ref[...].astype(y_ref.dtype)

    return kernel


def _conv_same(u_p, toe_table, tile, m0, nblk, d_min, d_max):
    bp, lp = u_p.shape
    kernel = _make_conv_kernel(tile, m0, nblk, d_min, d_max)

    toe_specs = [
        pl.BlockSpec((None, tile, tile),
                     (lambda j, k, jj=jj: (m0 - 1 - k + j * nblk + jj, 0, 0)))
        for jj in range(nblk)
    ]

    # Exact in-band matmul count for the cost estimate.
    n_mm = 0
    for jt in range(m0):
        k_lo = max(0, jt + (m0 - 1) - d_max)
        k_hi = min(m0 - 1, jt + (m0 - 1) - d_min)
        n_mm += max(0, k_hi - k_lo + 1)

    return pl.pallas_call(
        kernel,
        out_shape=jax.ShapeDtypeStruct((bp, lp), jnp.float32),
        grid=(m0 // nblk, m0),                       # (j groups, k) — k last
        in_specs=[pl.BlockSpec((bp, lp), lambda j, k: (0, 0))] + toe_specs,
        out_specs=pl.BlockSpec((bp, nblk * tile), lambda j, k: (0, j)),
        scratch_shapes=[pltpu.VMEM((bp, nblk * tile), jnp.float32)],
        compiler_params=pltpu.CompilerParams(
            dimension_semantics=("parallel", "arbitrary")),
        cost_estimate=pl.CostEstimate(
            flops=2 * bp * tile * tile * n_mm,
            transcendentals=0,
            bytes_accessed=4 * (2 * bp * lp + m0 * m0 * tile * tile)),
    )(u_p, *([toe_table] * nblk))


# ------------------------------- forward ------------------------------------

@jax.jit
def lti_forward(u, b, c, alpha, omega):
    B, c_in, L = u.shape
    assert c_in == 1, "reference assumes input_size == 1"
    eps = 1.0 / (L - 1)
    p_left = (L - 1) // 2      # PyTorch 'same': extra pad goes on the right

    # Tiling geometry (lane-dense, (8,128)-aligned, scalable in L).
    Lp = _round_up(L, 128)
    tile = 128
    for cand in (512, 256):
        if Lp % cand == 0:
            tile = cand
            break
    m0 = Lp // tile
    n_d = 2 * m0 - 1
    Bp = _round_up(B, 8)       # pad batch to a full f32 sublane group

    # Output tiles per conv grid step: amortizes per-step overhead while
    # keeping >= 2 blocks on the leading 'parallel' axis when possible (v7x).
    nblk = 1
    for cand in (4, 2):
        if m0 % cand == 0 and (m0 // cand) >= 2:
            nblk = cand
            break

    # Band of non-zero Toeplitz diagonals (support of the length-L filter in
    # the reversed/shifted/zero-padded layout).  Static Python ints.
    d0p = (Lp - 1) + p_left
    x_hi = d0p
    x_lo = d0p - (L - 1)
    d_max = min(x_hi // tile, n_d - 1)
    lo_shift = x_lo - 2 * tile + 1
    d_min = max(0, -((-lo_shift) // tile))        # ceil(lo_shift/tile), >= 0

    # NOTE: the reference's `self.c[j] * self.b[j]` only indexes validly for
    # j == 0; we implement the clearly intended c[0, j] * b[j, 0].
    coef = (2.0 * eps * c[0, :] * b[:, 0] * eps).astype(jnp.float32)   # (n,)
    params = jnp.stack([alpha.astype(jnp.float32),
                        omega.astype(jnp.float32),
                        coef], axis=0)                                  # (3, n)

    # Kernel 1: diagonal Toeplitz-tile table, built once per forward.
    toe_table = _build_toe_table(params, L, Lp, tile, p_left, eps,
                                 d_min, d_max)

    # Glue (plain JAX, O(B*L)): zero-pad u to the tiled geometry.
    u_p = jnp.pad(u[:, 0, :].astype(jnp.float32), ((0, Bp - B), (0, Lp - L)))

    # Kernel 2: pipelined banded block-Toeplitz matmul.
    y_p = _conv_same(u_p, toe_table, tile, m0, nblk, d_min, d_max)
    return y_p[:B, :L].reshape(B, 1, L)


class ConvolutionalLTI:
    """JAX/Pallas port of the PyTorch ConvolutionalLTI module."""

    def __init__(self, eigs_A, norm_b, norm_c, key):
        self.eigs_A = eigs_A
        n = sum(eigs_A.values())
        kb, kc = jax.random.split(key)
        b = jax.random.uniform(kb, (n, 1), dtype=jnp.float32) - 0.5
        self.b = b / jnp.linalg.norm(b) * norm_b
        c = jax.random.uniform(kc, (1, n), dtype=jnp.float32) - 0.5
        self.c = c / jnp.linalg.norm(c) * norm_c
        alphas, omegas = [], []
        for (alpha, omega), mul in eigs_A.items():
            alphas += [alpha] * mul
            omegas += [omega] * mul
        self.alpha = jnp.asarray(alphas, jnp.float32)
        self.omega = jnp.asarray(omegas, jnp.float32)
        self.n = n

    def __call__(self, u):
        return lti_forward(u, self.b, self.c, self.alpha, self.omega)


# ------------------------- independent numpy check --------------------------

def reference_numpy(u, b, c, eigs_A):
    u = np.asarray(u, np.float32)
    b = np.asarray(b, np.float32)
    c = np.asarray(c, np.float32)
    B, _, L = u.shape
    eps = 1.0 / (L - 1)
    grid = eps * np.arange(L, dtype=np.float32)
    f = np.zeros(L, np.float32)
    j = 0
    for (alpha, omega), mul in eigs_A.items():
        for _ in range(mul):
            f += (2 * eps * c[0, j] * b[j, 0] * eps
                  * np.exp(alpha * grid) * np.cos(omega * grid)).astype(np.float32)
            j += 1
    K = L
    p_left = (K - 1) // 2
    y = np.zeros((B, 1, L), np.float32)
    for bi in range(B):
        for t in range(L):
            acc = 0.0
            for k in range(K):
                s = t + k - p_left
                if 0 <= s < L:
                    acc += f[k] * u[bi, 0, s]
            y[bi, 0, t] = acc
    return y


if __name__ == "__main__":
    key = jax.random.PRNGKey(0)
    k_params, k_u = jax.random.split(key)

    eigs_A = {(-0.5, 3.0): 2, (-1.0, 6.0): 2, (0.2, 1.5): 1}   # n = 5 modes
    model = ConvolutionalLTI(eigs_A, norm_b=1.0, norm_c=2.0, key=k_params)

    B, L = 2, 16
    u = jax.random.normal(k_u, (B, 1, L), dtype=jnp.float32)

    y = jax.block_until_ready(model(u))

    y_ref = reference_numpy(u, model.b, model.c, eigs_A)
    np.testing.assert_allclose(np.asarray(y), y_ref, rtol=5e-4, atol=1e-5)
    print("KERNEL_OK")
</pallas_src>

<mosaic_0001>
module attributes {stable_mosaic.version = 11 : i64} {
  func.func @kernel(%arg0: i32, %arg1: memref<3x5xf32, #tpu.memory_space<smem>>, %arg2: memref<1x128x128xf32, #tpu.memory_space<vmem>>) attributes {dimension_semantics = [#tpu.dimension_semantics<parallel>], iteration_bounds = array<i64: 1>, scalar_prefetch = 0 : i64, scratch_operands = 0 : i64, tpu.core_type = #tpu.core_type<tc>, window_params = [{transform_indices = @transform_0, window_bounds = array<i64: 3, 5>}, {transform_indices = @transform_1, window_bounds = array<i64: 1, 128, 128>}]} {
    %c0_i32 = arith.constant 0 : i32
    %0 = arith.cmpi sge, %arg0, %c0_i32 : i32
    %c0_i32_0 = arith.constant 0 : i32
    %1 = arith.cmpi sle, %arg0, %c0_i32_0 : i32
    %2 = arith.andi %0, %1 : i1
    %true = arith.constant true
    %3 = arith.xori %2, %true : i1
    %4 = arith.extui %3 : i1 to i32
    %c0_i32_1 = arith.constant 0 : i32
    %5 = arith.cmpi ne, %4, %c0_i32_1 : i32
    scf.if %5 {
      %cst = arith.constant 0.000000e+00 : f32
      %8 = vector.broadcast %cst : f32 to vector<128x128xf32>
      %c0 = arith.constant 0 : index
      %c0_3 = arith.constant 0 : index
      %c0_4 = arith.constant 0 : index
      %9 = vector.load %arg2[%c0, %c0_3, %c0_4] : memref<1x128x128xf32, #tpu.memory_space<vmem>>, vector<1x128x128xf32>
      %10 = vector.shape_cast %9 : vector<1x128x128xf32> to vector<128x128xf32>
      %11 = vector.shape_cast %8 : vector<128x128xf32> to vector<1x128x128xf32>
      tpu.vector_store %arg2[%c0, %c0_3, %c0_4], %11 {strides = array<i32>} : memref<1x128x128xf32, #tpu.memory_space<vmem>>, vector<1x128x128xf32>,
    } else {
    }
    %6 = arith.extui %2 : i1 to i32
    %c0_i32_2 = arith.constant 0 : i32
    %7 = arith.cmpi ne, %6, %c0_i32_2 : i32
    scf.if %7 {
      %8 = tpu.iota {dimensions = array<i32: 1>} : vector<1x256xi32>
      %c128_i32 = arith.constant 128 : i32
      %9 = arith.muli %arg0, %c128_i32 : i32
      %10 = vector.broadcast %9 : i32 to vector<1x256xi32>
      %11 = arith.addi %10, %8 : vector<1x256xi32>
      %c134_i32 = arith.constant 134 : i32
      %12 = vector.broadcast %c134_i32 : i32 to vector<1x256xi32>
      %13 = arith.subi %12, %11 : vector<1x256xi32>
      %c0_i32_3 = arith.constant 0 : i32
      %14 = vector.broadcast %c0_i32_3 : i32 to vector<1x256xi32>
      %15 = arith.cmpi sge, %13, %14 : vector<1x256xi32>
      %c16_i32 = arith.constant 16 : i32
      %16 = vector.broadcast %c16_i32 : i32 to vector<1x256xi32>
      %17 = arith.cmpi slt, %13, %16 : vector<1x256xi32>
      %18 = arith.andi %15, %17 : vector<1x256xi1>
      %c0_i32_4 = arith.constant 0 : i32
      %c15_i32 = arith.constant 15 : i32
      %19 = vector.broadcast %c0_i32_4 : i32 to vector<1x256xi32>
      %20 = arith.maxsi %19, %13 : vector<1x256xi32>
      %21 = vector.broadcast %c15_i32 : i32 to vector<1x256xi32>
      %22 = arith.minsi %21, %20 : vector<1x256xi32>
      %23 = arith.sitofp %22 : vector<1x256xi32> to vector<1x256xf32>
      %cst = arith.constant 0.0666666701 : f32
      %24 = vector.broadcast %cst : f32 to vector<1x256xf32>
      %25 = arith.mulf %24, %23 : vector<1x256xf32>
      %cst_5 = arith.constant 0.000000e+00 : f32
      %26 = vector.broadcast %cst_5 : f32 to vector<1x256xf32>
      %c0 = arith.constant 0 : index
      %c0_6 = arith.constant 0 : index
      %27 = memref.load %arg1[%c0, %c0_6] : memref<3x5xf32, #tpu.memory_space<smem>>
      %c1 = arith.constant 1 : index
      %c0_7 = arith.constant 0 : index
      %28 = memref.load %arg1[%c1, %c0_7] : memref<3x5xf32, #tpu.memory_space<smem>>
      %c2 = arith.constant 2 : index
      %c0_8 = arith.constant 0 : index
      %29 = memref.load %arg1[%c2, %c0_8] : memref<3x5xf32, #tpu.memory_space<smem>>
      %30 = vector.broadcast %27 : f32 to vector<1x256xf32>
      %31 = arith.mulf %30, %25 : vector<1x256xf32>
      %32 = math.exp %31 : vector<1x256xf32>
      %33 = vector.broadcast %29 : f32 to vector<1x256xf32>
      %34 = arith.mulf %33, %32 : vector<1x256xf32>
      %35 = vector.broadcast %28 : f32 to vector<1x256xf32>
      %36 = arith.mulf %35, %25 : vector<1x256xf32>
      %37 = math.cos %36 : vector<1x256xf32>
      %38 = arith.mulf %34, %37 : vector<1x256xf32>
      %39 = arith.addf %26, %38 : vector<1x256xf32>
      %c0_9 = arith.constant 0 : index
      %c1_10 = arith.constant 1 : index
      %40 = memref.load %arg1[%c0_9, %c1_10] : memref<3x5xf32, #tpu.memory_space<smem>>
      %c1_11 = arith.constant 1 : index
      %c1_12 = arith.constant 1 : index
      %41 = memref.load %arg1[%c1_11, %c1_12] : memref<3x5xf32, #tpu.memory_space<smem>>
      %c2_13 = arith.constant 2 : index
      %c1_14 = arith.constant 1 : index
      %42 = memref.load %arg1[%c2_13, %c1_14] : memref<3x5xf32, #tpu.memory_space<smem>>
      %43 = vector.broadcast %40 : f32 to vector<1x256xf32>
      %44 = arith.mulf %43, %25 : vector<1x256xf32>
      %45 = math.exp %44 : vector<1x256xf32>
      %46 = vector.broadcast %42 : f32 to vector<1x256xf32>
      %47 = arith.mulf %46, %45 : vector<1x256xf32>
      %48 = vector.broadcast %41 : f32 to vector<1x256xf32>
      %49 = arith.mulf %48, %25 : vector<1x256xf32>
      %50 = math.cos %49 : vector<1x256xf32>
      %51 = arith.mulf %47, %50 : vector<1x256xf32>
      %52 = arith.addf %39, %51 : vector<1x256xf32>
      %c0_15 = arith.constant 0 : index
      %c2_16 = arith.constant 2 : index
      %53 = memref.load %arg1[%c0_15, %c2_16] : memref<3x5xf32, #tpu.memory_space<smem>>
      %c1_17 = arith.constant 1 : index
      %c2_18 = arith.constant 2 : index
      %54 = memref.load %arg1[%c1_17, %c2_18] : memref<3x5xf32, #tpu.memory_space<smem>>
      %c2_19 = arith.constant 2 : index
      %c2_20 = arith.constant 2 : index
      %55 = memref.load %arg1[%c2_19, %c2_20] : memref<3x5xf32, #tpu.memory_space<smem>>
      %56 = vector.broadcast %53 : f32 to vector<1x256xf32>
      %57 = arith.mulf %56, %25 : vector<1x256xf32>
      %58 = math.exp %57 : vector<1x256xf32>
      %59 = vector.broadcast %55 : f32 to vector<1x256xf32>
      %60 = arith.mulf %59, %58 : vector<1x256xf32>
      %61 = vector.broadcast %54 : f32 to vector<1x256xf32>
      %62 = arith.mulf %61, %25 : vector<1x256xf32>
      %63 = math.cos %62 : vector<1x256xf32>
      %64 = arith.mulf %60, %63 : vector<1x256xf32>
      %65 = arith.addf %52, %64 : vector<1x256xf32>
      %c0_21 = arith.constant 0 : index
      %c3 = arith.constant 3 : index
      %66 = memref.load %arg1[%c0_21, %c3] : memref<3x5xf32, #tpu.memory_space<smem>>
      %c1_22 = arith.constant 1 : index
      %c3_23 = arith.constant 3 : index
      %67 = memref.load %arg1[%c1_22, %c3_23] : memref<3x5xf32, #tpu.memory_space<smem>>
      %c2_24 = arith.constant 2 : index
      %c3_25 = arith.constant 3 : index
      %68 = memref.load %arg1[%c2_24, %c3_25] : memref<3x5xf32, #tpu.memory_space<smem>>
      %69 = vector.broadcast %66 : f32 to vector<1x256xf32>
      %70 = arith.mulf %69, %25 : vector<1x256xf32>
      %71 = math.exp %70 : vector<1x256xf32>
      %72 = vector.broadcast %68 : f32 to vector<1x256xf32>
      %73 = arith.mulf %72, %71 : vector<1x256xf32>
      %74 = vector.broadcast %67 : f32 to vector<1x256xf32>
      %75 = arith.mulf %74, %25 : vector<1x256xf32>
      %76 = math.cos %75 : vector<1x256xf32>
      %77 = arith.mulf %73, %76 : vector<1x256xf32>
      %78 = arith.addf %65, %77 : vector<1x256xf32>
      %c0_26 = arith.constant 0 : index
      %c4 = arith.constant 4 : index
      %79 = memref.load %arg1[%c0_26, %c4] : memref<3x5xf32, #tpu.memory_space<smem>>
      %c1_27 = arith.constant 1 : index
      %c4_28 = arith.constant 4 : index
      %80 = memref.load %arg1[%c1_27, %c4_28] : memref<3x5xf32, #tpu.memory_space<smem>>
      %c2_29 = arith.constant 2 : index
      %c4_30 = arith.constant 4 : index
      %81 = memref.load %arg1[%c2_29, %c4_30] : memref<3x5xf32, #tpu.memory_space<smem>>
      %82 = vector.broadcast %79 : f32 to vector<1x256xf32>
      %83 = arith.mulf %82, %25 : vector<1x256xf32>
      %84 = math.exp %83 : vector<1x256xf32>
      %85 = vector.broadcast %81 : f32 to vector<1x256xf32>
      %86 = arith.mulf %85, %84 : vector<1x256xf32>
      %87 = vector.broadcast %80 : f32 to vector<1x256xf32>
      %88 = arith.mulf %87, %25 : vector<1x256xf32>
      %89 = math.cos %88 : vector<1x256xf32>
      %90 = arith.mulf %86, %89 : vector<1x256xf32>
      %91 = arith.addf %78, %90 : vector<1x256xf32>
      %cst_31 = arith.constant 0.000000e+00 : f32
      %92 = vector.broadcast %cst_31 : f32 to vector<1x256xf32>
      %93 = arith.select %18, %91, %92 : vector<1x256xi1>, vector<1x256xf32>
      %94 = vector.extract_strided_slice %93 {offsets = [0, 127], sizes = [1, 128], strides = [1, 1]} : vector<1x256xf32> to vector<1x128xf32>
      %95 = vector.extract_strided_slice %93 {offsets = [0, 126], sizes = [1, 128], strides = [1, 1]} : vector<1x256xf32> to vector<1x128xf32>
      %96 = vector.extract_strided_slice %93 {offsets = [0, 125], sizes = [1, 128], strides = [1, 1]} : vector<1x256xf32> to vector<1x128xf32>
      %97 = vector.extract_strided_slice %93 {offsets = [0, 124], sizes = [1, 128], strides = [1, 1]} : vector<1x256xf32> to vector<1x128xf32>
      %98 = vector.extract_strided_slice %93 {offsets = [0, 123], sizes = [1, 128], strides = [1, 1]} : vector<1x256xf32> to vector<1x128xf32>
      %99 = vector.extract_strided_slice %93 {offsets = [0, 122], sizes = [1, 128], strides = [1, 1]} : vector<1x256xf32> to vector<1x128xf32>
      %100 = vector.extract_strided_slice %93 {offsets = [0, 121], sizes = [1, 128], strides = [1, 1]} : vector<1x256xf32> to vector<1x128xf32>
      %101 = vector.extract_strided_slice %93 {offsets = [0, 120], sizes = [1, 128], strides = [1, 1]} : vector<1x256xf32> to vector<1x128xf32>
      %102 = tpu.concatenate %94, %95, %96, %97, %98, %99, %100, %101 in 0 : vector<1x128xf32>, vector<1x128xf32>, vector<1x128xf32>, vector<1x128xf32>, vector<1x128xf32>, vector<1x128xf32>, vector<1x128xf32>, vector<1x128xf32> -> vector<8x128xf32>
      %c0_32 = arith.constant 0 : index
      %c0_33 = arith.constant 0 : index
      %c0_34 = arith.constant 0 : index
      %103 = vector.load %arg2[%c0_32, %c0_33, %c0_34] : memref<1x128x128xf32, #tpu.memory_space<vmem>>, vector<1x8x128xf32>
      %104 = vector.shape_cast %103 : vector<1x8x128xf32> to vector<8x128xf32>
      %105 = vector.shape_cast %102 : vector<8x128xf32> to vector<1x8x128xf32>
      tpu.vector_store %arg2[%c0_32, %c0_33, %c0_34], %105 {strides = array<i32>} : memref<1x128x128xf32, #tpu.memory_space<vmem>>, vector<1x8x128xf32>,
      %106 = vector.extract_strided_slice %93 {offsets = [0, 119], sizes = [1, 128], strides = [1, 1]} : vector<1x256xf32> to vector<1x128xf32>
      %107 = vector.extract_strided_slice %93 {offsets = [0, 118], sizes = [1, 128], strides = [1, 1]} : vector<1x256xf32> to vector<1x128xf32>
      %108 = vector.extract_strided_slice %93 {offsets = [0, 117], sizes = [1, 128], strides = [1, 1]} : vector<1x256xf32> to vector<1x128xf32>
      %109 = vector.extract_strided_slice %93 {offsets = [0, 116], sizes = [1, 128], strides = [1, 1]} : vector<1x256xf32> to vector<1x128xf32>
      %110 = vector.extract_strided_slice %93 {offsets = [0, 115], sizes = [1, 128], strides = [1, 1]} : vector<1x256xf32> to vector<1x128xf32>
      %111 = vector.extract_strided_slice %93 {offsets = [0, 114], sizes = [1, 128], strides = [1, 1]} : vector<1x256xf32> to vector<1x128xf32>
      %112 = vector.extract_strided_slice %93 {offsets = [0, 113], sizes = [1, 128], strides = [1, 1]} : vector<1x256xf32> to vector<1x128xf32>
      %113 = vector.extract_strided_slice %93 {offsets = [0, 112], sizes = [1, 128], strides = [1, 1]} : vector<1x256xf32> to vector<1x128xf32>
      %114 = tpu.concatenate %106, %107, %108, %109, %110, %111, %112, %113 in 0 : vector<1x128xf32>, vector<1x128xf32>, vector<1x128xf32>, vector<1x128xf32>, vector<1x128xf32>, vector<1x128xf32>, vector<1x128xf32>, vector<1x128xf32> -> vector<8x128xf32>
      %c0_35 = arith.constant 0 : index
      %c8 = arith.constant 8 : index
      %c0_36 = arith.constant 0 : index
      %115 = vector.load %arg2[%c0_35, %c8, %c0_36] : memref<1x128x128xf32, #tpu.memory_space<vmem>>, vector<1x8x128xf32>
      %116 = vector.shape_cast %115 : vector<1x8x128xf32> to vector<8x128xf32>
      %117 = vector.shape_cast %114 : vector<8x128xf32> to vector<1x8x128xf32>
      tpu.vector_store %arg2[%c0_35, %c8, %c0_36], %117 {strides = array<i32>} : memref<1x128x128xf32, #tpu.memory_space<vmem>>, vector<1x8x128xf32>,
      %118 = vector.extract_strided_slice %93 {offsets = [0, 111], sizes = [1, 128], strides = [1, 1]} : vector<1x256xf32> to vector<1x128xf32>
      %119 = vector.extract_strided_slice %93 {offsets = [0, 110], sizes = [1, 128], strides = [1, 1]} : vector<1x256xf32> to vector<1x128xf32>
      %120 = vector.extract_strided_slice %93 {offsets = [0, 109], sizes = [1, 128], strides = [1, 1]} : vector<1x256xf32> to vector<1x128xf32>
      %121 = vector.extract_strided_slice %93 {offsets = [0, 108], sizes = [1, 128], strides = [1, 1]} : vector<1x256xf32> to vector<1x128xf32>
      %122 = vector.extract_strided_slice %93 {offsets = [0, 107], sizes = [1, 128], strides = [1, 1]} : vector<1x256xf32> to vector<1x128xf32>
      %123 = vector.extract_strided_slice %93 {offsets = [0, 106], sizes = [1, 128], strides = [1, 1]} : vector<1x256xf32> to vector<1x128xf32>
      %124 = vector.extract_strided_slice %93 {offsets = [0, 105], sizes = [1, 128], strides = [1, 1]} : vector<1x256xf32> to vector<1x128xf32>
      %125 = vector.extract_strided_slice %93 {offsets = [0, 104], sizes = [1, 128], strides = [1, 1]} : vector<1x256xf32> to vector<1x128xf32>
      %126 = tpu.concatenate %118, %119, %120, %121, %122, %123, %124, %125 in 0 : vector<1x128xf32>, vector<1x128xf32>, vector<1x128xf32>, vector<1x128xf32>, vector<1x128xf32>, vector<1x128xf32>, vector<1x128xf32>, vector<1x128xf32> -> vector<8x128xf32>
      %c0_37 = arith.constant 0 : index
      %c16 = arith.constant 16 : index
      %c0_38 = arith.constant 0 : index
      %127 = vector.load %arg2[%c0_37, %c16, %c0_38] : memref<1x128x128xf32, #tpu.memory_space<vmem>>, vector<1x8x128xf32>
      %128 = vector.shape_cast %127 : vector<1x8x128xf32> to vector<8x128xf32>
      %129 = vector.shape_cast %126 : vector<8x128xf32> to vector<1x8x128xf32>
      tpu.vector_store %arg2[%c0_37, %c16, %c0_38], %129 {strides = array<i32>} : memref<1x128x128xf32, #tpu.memory_space<vmem>>, vector<1x8x128xf32>,
      %130 = vector.extract_strided_slice %93 {offsets = [0, 103], sizes = [1, 128], strides = [1, 1]} : vector<1x256xf32> to vector<1x128xf32>
      %131 = vector.extract_strided_slice %93 {offsets = [0, 102], sizes = [1, 128], strides = [1, 1]} : vector<1x256xf32> to vector<1x128xf32>
      %132 = vector.extract_strided_slice %93 {offsets = [0, 101], sizes = [1, 128], strides = [1, 1]} : vector<1x256xf32> to vector<1x128xf32>
      %133 = vector.extract_strided_slice %93 {offsets = [0, 100], sizes = [1, 128], strides = [1, 1]} : vector<1x256xf32> to vector<1x128xf32>
      %134 = vector.extract_strided_slice %93 {offsets = [0, 99], sizes = [1, 128], strides = [1, 1]} : vector<1x256xf32> to vector<1x128xf32>
      %135 = vector.extract_strided_slice %93 {offsets = [0, 98], sizes = [1, 128], strides = [1, 1]} : vector<1x256xf32> to vector<1x128xf32>
      %136 = vector.extract_strided_slice %93 {offsets = [0, 97], sizes = [1, 128], strides = [1, 1]} : vector<1x256xf32> to vector<1x128xf32>
      %137 = vector.extract_strided_slice %93 {offsets = [0, 96], sizes = [1, 128], strides = [1, 1]} : vector<1x256xf32> to vector<1x128xf32>
      %138 = tpu.concatenate %130, %131, %132, %133, %134, %135, %136, %137 in 0 : vector<1x128xf32>, vector<1x128xf32>, vector<1x128xf32>, vector<1x128xf32>, vector<1x128xf32>, vector<1x128xf32>, vector<1x128xf32>, vector<1x128xf32> -> vector<8x128xf32>
      %c0_39 = arith.constant 0 : index
      %c24 = arith.constant 24 : index
      %c0_40 = arith.constant 0 : index
      %139 = vector.load %arg2[%c0_39, %c24, %c0_40] : memref<1x128x128xf32, #tpu.memory_space<vmem>>, vector<1x8x128xf32>
      %140 = vector.shape_cast %139 : vector<1x8x128xf32> to vector<8x128xf32>
      %141 = vector.shape_cast %138 : vector<8x128xf32> to vector<1x8x128xf32>
      tpu.vector_store %arg2[%c0_39, %c24, %c0_40], %141 {strides = array<i32>} : memref<1x128x128xf32, #tpu.memory_space<vmem>>, vector<1x8x128xf32>,
      %142 = vector.extract_strided_slice %93 {offsets = [0, 95], sizes = [1, 128], strides = [1, 1]} : vector<1x256xf32> to vector<1x128xf32>
      %143 = vector.extract_strided_slice %93 {offsets = [0, 94], sizes = [1, 128], strides = [1, 1]} : vector<1x256xf32> to vector<1x128xf32>
      %144 = vector.extract_strided_slice %93 {offsets = [0, 93], sizes = [1, 128], strides = [1, 1]} : vector<1x256xf32> to vector<1x128xf32>
      %145 = vector.extract_strided_slice %93 {offsets = [0, 92], sizes = [1, 128], strides = [1, 1]} : vector<1x256xf32> to vector<1x128xf32>
      %146 = vector.extract_strided_slice %93 {offsets = [0, 91], sizes = [1, 128], strides = [1, 1]} : vector<1x256xf32> to vector<1x128xf32>
      %147 = vector.extract_strided_slice %93 {offsets = [0, 90], sizes = [1, 128], strides = [1, 1]} : vector<1x256xf32> to vector<1x128xf32>
      %148 = vector.extract_strided_slice %93 {offsets = [0, 89], sizes = [1, 128], strides = [1, 1]} : vector<1x256xf32> to vector<1x128xf32>
      %149 = vector.extract_strided_slice %93 {offsets = [0, 88], sizes = [1, 128], strides = [1, 1]} : vector<1x256xf32> to vector<1x128xf32>
      %150 = tpu.concatenate %142, %143, %144, %145, %146, %147, %148, %149 in 0 : vector<1x128xf32>, vector<1x128xf32>, vector<1x128xf32>, vector<1x128xf32>, vector<1x128xf32>, vector<1x128xf32>, vector<1x128xf32>, vector<1x128xf32> -> vector<8x128xf32>
      %c0_41 = arith.constant 0 : index
      %c32 = arith.constant 32 : index
      %c0_42 = arith.constant 0 : index
      %151 = vector.load %arg2[%c0_41, %c32, %c0_42] : memref<1x128x128xf32, #tpu.memory_space<vmem>>, vector<1x8x128xf32>
      %152 = vector.shape_cast %151 : vector<1x8x128xf32> to vector<8x128xf32>
      %153 = vector.shape_cast %150 : vector<8x128xf32> to vector<1x8x128xf32>
      tpu.vector_store %arg2[%c0_41, %c32, %c0_42], %153 {strides = array<i32>} : memref<1x128x128xf32, #tpu.memory_space<vmem>>, vector<1x8x128xf32>,
      %154 = vector.extract_strided_slice %93 {offsets = [0, 87], sizes = [1, 128], strides = [1, 1]} : vector<1x256xf32> to vector<1x128xf32>
      %155 = vector.extract_strided_slice %93 {offsets = [0, 86], sizes = [1, 128], strides = [1, 1]} : vector<1x256xf32> to vector<1x128xf32>
      %156 = vector.extract_strided_slice %93 {offsets = [0, 85], sizes = [1, 128], strides = [1, 1]} : vector<1x256xf32> to vector<1x128xf32>
      %157 = vector.extract_strided_slice %93 {offsets = [0, 84], sizes = [1, 128], strides = [1, 1]} : vector<1x256xf32> to vector<1x128xf32>
      %158 = vector.extract_strided_slice %93 {offsets = [0, 83], sizes = [1, 128], strides = [1, 1]} : vector<1x256xf32> to vector<1x128xf32>
      %159 = vector.extract_strided_slice %93 {offsets = [0, 82], sizes = [1, 128], strides = [1, 1]} : vector<1x256xf32> to vector<1x128xf32>
      %160 = vector.extract_strided_slice %93 {offsets = [0, 81], sizes = [1, 128], strides = [1, 1]} : vector<1x256xf32> to vector<1x128xf32>
      %161 = vector.extract_strided_slice %93 {offsets = [0, 80], sizes = [1, 128], strides = [1, 1]} : vector<1x256xf32> to vector<1x128xf32>
      %162 = tpu.concatenate %154, %155, %156, %157, %158, %159, %160, %161 in 0 : vector<1x128xf32>, vector<1x128xf32>, vector<1x128xf32>, vector<1x128xf32>, vector<1x128xf32>, vector<1x128xf32>, vector<1x128xf32>, vector<1x128xf32> -> vector<8x128xf32>
      %c0_43 = arith.constant 0 : index
      %c40 = arith.constant 40 : index
      %c0_44 = arith.constant 0 : index
      %163 = vector.load %arg2[%c0_43, %c40, %c0_44] : memref<1x128x128xf32, #tpu.memory_space<vmem>>, vector<1x8x128xf32>
      %164 = vector.shape_cast %163 : vector<1x8x128xf32> to vector<8x128xf32>
      %165 = vector.shape_cast %162 : vector<8x128xf32> to vector<1x8x128xf32>
      tpu.vector_store %arg2[%c0_43, %c40, %c0_44], %165 {strides = array<i32>} : memref<1x128x128xf32, #tpu.memory_space<vmem>>, vector<1x8x128xf32>,
      %166 = vector.extract_strided_slice %93 {offsets = [0, 79], sizes = [1, 128], strides = [1, 1]} : vector<1x256xf32> to vector<1x128xf32>
      %167 = vector.extract_strided_slice %93 {offsets = [0, 78], sizes = [1, 128], strides = [1, 1]} : vector<1x256xf32> to vector<1x128xf32>
      %168 = vector.extract_strided_slice %93 {offsets = [0, 77], sizes = [1, 128], strides = [1, 1]} : vector<1x256xf32> to vector<1x128xf32>
      %169 = vector.extract_strided_slice %93 {offsets = [0, 76], sizes = [1, 128], strides = [1, 1]} : vector<1x256xf32> to vector<1x128xf32>
      %170 = vector.extract_strided_slice %93 {offsets = [0, 75], sizes = [1, 128], strides = [1, 1]} : vector<1x256xf32> to vector<1x128xf32>
      %171 = vector.extract_strided_slice %93 {offsets = [0, 74], sizes = [1, 128], strides = [1, 1]} : vector<1x256xf32> to vector<1x128xf32>
      %172 = vector.extract_strided_slice %93 {offsets = [0, 73], sizes = [1, 128], strides = [1, 1]} : vector<1x256xf32> to vector<1x128xf32>
      %173 = vector.extract_strided_slice %93 {offsets = [0, 72], sizes = [1, 128], strides = [1, 1]} : vector<1x256xf32> to vector<1x128xf32>
      %174 = tpu.concatenate %166, %167, %168, %169, %170, %171, %172, %173 in 0 : vector<1x128xf32>, vector<1x128xf32>, vector<1x128xf32>, vector<1x128xf32>, vector<1x128xf32>, vector<1x128xf32>, vector<1x128xf32>, vector<1x128xf32> -> vector<8x128xf32>
      %c0_45 = arith.constant 0 : index
      %c48 = arith.constant 48 : index
      %c0_46 = arith.constant 0 : index
      %175 = vector.load %arg2[%c0_45, %c48, %c0_46] : memref<1x128x128xf32, #tpu.memory_space<vmem>>, vector<1x8x128xf32>
      %176 = vector.shape_cast %175 : vector<1x8x128xf32> to vector<8x128xf32>
      %177 = vector.shape_cast %174 : vector<8x128xf32> to vector<1x8x128xf32>
      tpu.vector_store %arg2[%c0_45, %c48, %c0_46], %177 {strides = array<i32>} : memref<1x128x128xf32, #tpu.memory_space<vmem>>, vector<1x8x128xf32>,
      %178 = vector.extract_strided_slice %93 {offsets = [0, 71], sizes = [1, 128], strides = [1, 1]} : vector<1x256xf32> to vector<1x128xf32>
      %179 = vector.extract_strided_slice %93 {offsets = [0, 70], sizes = [1, 128], strides = [1, 1]} : vector<1x256xf32> to vector<1x128xf32>
      %180 = vector.extract_strided_slice %93 {offsets = [0, 69], sizes = [1, 128], strides = [1, 1]} : vector<1x256xf32> to vector<1x128xf32>
      %181 = vector.extract_strided_slice %93 {offsets = [0, 68], sizes = [1, 128], strides = [1, 1]} : vector<1x256xf32> to vector<1x128xf32>
      %182 = vector.extract_strided_slice %93 {offsets = [0, 67], sizes = [1, 128], strides = [1, 1]} : vector<1x256xf32> to vector<1x128xf32>
      %183 = vector.extract_strided_slice %93 {offsets = [0, 66], sizes = [1, 128], strides = [1, 1]} : vector<1x256xf32> to vector<1x128xf32>
      %184 = vector.extract_strided_slice %93 {offsets = [0, 65], sizes = [1, 128], strides = [1, 1]} : vector<1x256xf32> to vector<1x128xf32>
      %185 = vector.extract_strided_slice %93 {offsets = [0, 64], sizes = [1, 128], strides = [1, 1]} : vector<1x256xf32> to vector<1x128xf32>
      %186 = tpu.concatenate %178, %179, %180, %181, %182, %183, %184, %185 in 0 : vector<1x128xf32>, vector<1x128xf32>, vector<1x128xf32>, vector<1x128xf32>, vector<1x128xf32>, vector<1x128xf32>, vector<1x128xf32>, vector<1x128xf32> -> vector<8x128xf32>
      %c0_47 = arith.constant 0 : index
      %c56 = arith.constant 56 : index
      %c0_48 = arith.constant 0 : index
      %187 = vector.load %arg2[%c0_47, %c56, %c0_48] : memref<1x128x128xf32, #tpu.memory_space<vmem>>, vector<1x8x128xf32>
      %188 = vector.shape_cast %187 : vector<1x8x128xf32> to vector<8x128xf32>
      %189 = vector.shape_cast %186 : vector<8x128xf32> to vector<1x8x128xf32>
      tpu.vector_store %arg2[%c0_47, %c56, %c0_48], %189 {strides = array<i32>} : memref<1x128x128xf32, #tpu.memory_space<vmem>>, vector<1x8x128xf32>,
      %190 = vector.extract_strided_slice %93 {offsets = [0, 63], sizes = [1, 128], strides = [1, 1]} : vector<1x256xf32> to vector<1x128xf32>
      %191 = vector.extract_strided_slice %93 {offsets = [0, 62], sizes = [1, 128], strides = [1, 1]} : vector<1x256xf32> to vector<1x128xf32>
      %192 = vector.extract_strided_slice %93 {offsets = [0, 61], sizes = [1, 128], strides = [1, 1]} : vector<1x256xf32> to vector<1x128xf32>
      %193 = vector.extract_strided_slice %93 {offsets = [0, 60], sizes = [1, 128], strides = [1, 1]} : vector<1x256xf32> to vector<1x128xf32>
      %194 = vector.extract_strided_slice %93 {offsets = [0, 59], sizes = [1, 128], strides = [1, 1]} : vector<1x256xf32> to vector<1x128xf32>
      %195 = vector.extract_strided_slice %93 {offsets = [0, 58], sizes = [1, 128], strides = [1, 1]} : vector<1x256xf32> to vector<1x128xf32>
      %196 = vector.extract_strided_slice %93 {offsets = [0, 57], sizes = [1, 128], strides = [1, 1]} : vector<1x256xf32> to vector<1x128xf32>
      %197 = vector.extract_strided_slice %93 {offsets = [0, 56], sizes = [1, 128], strides = [1, 1]} : vector<1x256xf32> to vector<1x128xf32>
      %198 = tpu.concatenate %190, %191, %192, %193, %194, %195, %196, %197 in 0 : vector<1x128xf32>, vector<1x128xf32>, vector<1x128xf32>, vector<1x128xf32>, vector<1x128xf32>, vector<1x128xf32>, vector<1x128xf32>, vector<1x128xf32> -> vector<8x128xf32>
      %c0_49 = arith.constant 0 : index
      %c64 = arith.constant 64 : index
      %c0_50 = arith.constant 0 : index
      %199 = vector.load %arg2[%c0_49, %c64, %c0_50] : memref<1x128x128xf32, #tpu.memory_space<vmem>>, vector<1x8x128xf32>
      %200 = vector.shape_cast %199 : vector<1x8x128xf32> to vector<8x128xf32>
      %201 = vector.shape_cast %198 : vector<8x128xf32> to vector<1x8x128xf32>
      tpu.vector_store %arg2[%c0_49, %c64, %c0_50], %201 {strides = array<i32>} : memref<1x128x128xf32, #tpu.memory_space<vmem>>, vector<1x8x128xf32>,
      %202 = vector.extract_strided_slice %93 {offsets = [0, 55], sizes = [1, 128], strides = [1, 1]} : vector<1x256xf32> to vector<1x128xf32>
      %203 = vector.extract_strided_slice %93 {offsets = [0, 54], sizes = [1, 128], strides = [1, 1]} : vector<1x256xf32> to vector<1x128xf32>
      %204 = vector.extract_strided_slice %93 {offsets = [0, 53], sizes = [1, 128], strides = [1, 1]} : vector<1x256xf32> to vector<1x128xf32>
      %205 = vector.extract_strided_slice %93 {offsets = [0, 52], sizes = [1, 128], strides = [1, 1]} : vector<1x256xf32> to vector<1x128xf32>
      %206 = vector.extract_strided_slice %93 {offsets = [0, 51], sizes = [1, 128], strides = [1, 1]} : vector<1x256xf32> to vector<1x128xf32>
      %207 = vector.extract_strided_slice %93 {offsets = [0, 50], sizes = [1, 128], strides = [1, 1]} : vector<1x256xf32> to vector<1x128xf32>
      %208 = vector.extract_strided_slice %93 {offsets = [0, 49], sizes = [1, 128], strides = [1, 1]} : vector<1x256xf32> to vector<1x128xf32>
      %209 = vector.extract_strided_slice %93 {offsets = [0, 48], sizes = [1, 128], strides = [1, 1]} : vector<1x256xf32> to vector<1x128xf32>
      %210 = tpu.concatenate %202, %203, %204, %205, %206, %207, %208, %209 in 0 : vector<1x128xf32>, vector<1x128xf32>, vector<1x128xf32>, vector<1x128xf32>, vector<1x128xf32>, vector<1x128xf32>, vector<1x128xf32>, vector<1x128xf32> -> vector<8x128xf32>
      %c0_51 = arith.constant 0 : index
      %c72 = arith.constant 72 : index
      %c0_52 = arith.constant 0 : index
      %211 = vector.load %arg2[%c0_51, %c72, %c0_52] : memref<1x128x128xf32, #tpu.memory_space<vmem>>, vector<1x8x128xf32>
      %212 = vector.shape_cast %211 : vector<1x8x128xf32> to vector<8x128xf32>
      %213 = vector.shape_cast %210 : vector<8x128xf32> to vector<1x8x128xf32>
      tpu.vector_store %arg2[%c0_51, %c72, %c0_52], %213 {strides = array<i32>} : memref<1x128x128xf32, #tpu.memory_space<vmem>>, vector<1x8x128xf32>,
      %214 = vector.extract_strided_slice %93 {offsets = [0, 47], sizes = [1, 128], strides = [1, 1]} : vector<1x256xf32> to vector<1x128xf32>
      %215 = vector.extract_strided_slice %93 {offsets = [0, 46], sizes = [1, 128], strides = [1, 1]} : vector<1x256xf32> to vector<1x128xf32>
      %216 = vector.extract_strided_slice %93 {offsets = [0, 45], sizes = [1, 128], strides = [1, 1]} : vector<1x256xf32> to vector<1x128xf32>
      %217 = vector.extract_strided_slice %93 {offsets = [0, 44], sizes = [1, 128], strides = [1, 1]} : vector<1x256xf32> to vector<1x128xf32>
      %218 = vector.extract_strided_slice %93 {offsets = [0, 43], sizes = [1, 128], strides = [1, 1]} : vector<1x256xf32> to vector<1x128xf32>
      %219 = vector.extract_strided_slice %93 {offsets = [0, 42], sizes = [1, 128], strides = [1, 1]} : vector<1x256xf32> to vector<1x128xf32>
      %220 = vector.extract_strided_slice %93 {offsets = [0, 41], sizes = [1, 128], strides = [1, 1]} : vector<1x256xf32> to vector<1x128xf32>
      %221 = vector.extract_strided_slice %93 {offsets = [0, 40], sizes = [1, 128], strides = [1, 1]} : vector<1x256xf32> to vector<1x128xf32>
      %222 = tpu.concatenate %214, %215, %216, %217, %218, %219, %220, %221 in 0 : vector<1x128xf32>, vector<1x128xf32>, vector<1x128xf32>, vector<1x128xf32>, vector<1x128xf32>, vector<1x128xf32>, vector<1x128xf32>, vector<1x128xf32> -> vector<8x128xf32>
      %c0_53 = arith.constant 0 : index
      %c80 = arith.constant 80 : index
      %c0_54 = arith.constant 0 : index
      %223 = vector.load %arg2[%c0_53, %c80, %c0_54] : memref<1x128x128xf32, #tpu.memory_space<vmem>>, vector<1x8x128xf32>
      %224 = vector.shape_cast %223 : vector<1x8x128xf32> to vector<8x128xf32>
      %225 = vector.shape_cast %222 : vector<8x128xf32> to vector<1x8x128xf32>
      tpu.vector_store %arg2[%c0_53, %c80, %c0_54], %225 {strides = array<i32>} : memref<1x128x128xf32, #tpu.memory_space<vmem>>, vector<1x8x128xf32>,
      %226 = vector.extract_strided_slice %93 {offsets = [0, 39], sizes = [1, 128], strides = [1, 1]} : vector<1x256xf32> to vector<1x128xf32>
      %227 = vector.extract_strided_slice %93 {offsets = [0, 38], sizes = [1, 128], strides = [1, 1]} : vector<1x256xf32> to vector<1x128xf32>
      %228 = vector.extract_strided_slice %93 {offsets = [0, 37], sizes = [1, 128], strides = [1, 1]} : vector<1x256xf32> to vector<1x128xf32>
      %229 = vector.extract_strided_slice %93 {offsets = [0, 36], sizes = [1, 128], strides = [1, 1]} : vector<1x256xf32> to vector<1x128xf32>
      %230 = vector.extract_strided_slice %93 {offsets = [0, 35], sizes = [1, 128], strides = [1, 1]} : vector<1x256xf32> to vector<1x128xf32>
      %231 = vector.extract_strided_slice %93 {offsets = [0, 34], sizes = [1, 128], strides = [1, 1]} : vector<1x256xf32> to vector<1x128xf32>
      %232 = vector.extract_strided_slice %93 {offsets = [0, 33], sizes = [1, 128], strides = [1, 1]} : vector<1x256xf32> to vector<1x128xf32>
      %233 = vector.extract_strided_slice %93 {offsets = [0, 32], sizes = [1, 128], strides = [1, 1]} : vector<1x256xf32> to vector<1x128xf32>
      %234 = tpu.concatenate %226, %227, %228, %229, %230, %231, %232, %233 in 0 : vector<1x128xf32>, vector<1x128xf32>, vector<1x128xf32>, vector<1x128xf32>, vector<1x128xf32>, vector<1x128xf32>, vector<1x128xf32>, vector<1x128xf32> -> vector<8x128xf32>
      %c0_55 = arith.constant 0 : index
      %c88 = arith.constant 88 : index
      %c0_56 = arith.constant 0 : index
      %235 = vector.load %arg2[%c0_55, %c88, %c0_56] : memref<1x128x128xf32, #tpu.memory_space<vmem>>, vector<1x8x128xf32>
      %236 = vector.shape_cast %235 : vector<1x8x128xf32> to vector<8x128xf32>
      %237 = vector.shape_cast %234 : vector<8x128xf32> to vector<1x8x128xf32>
      tpu.vector_store %arg2[%c0_55, %c88, %c0_56], %237 {strides = array<i32>} : memref<1x128x128xf32, #tpu.memory_space<vmem>>, vector<1x8x128xf32>,
      %238 = vector.extract_strided_slice %93 {offsets = [0, 31], sizes = [1, 128], strides = [1, 1]} : vector<1x256xf32> to vector<1x128xf32>
      %239 = vector.extract_strided_slice %93 {offsets = [0, 30], sizes = [1, 128], strides = [1, 1]} : vector<1x256xf32> to vector<1x128xf32>
      %240 = vector.extract_strided_slice %93 {offsets = [0, 29], sizes = [1, 128], strides = [1, 1]} : vector<1x256xf32> to vector<1x128xf32>
      %241 = vector.extract_strided_slice %93 {offsets = [0, 28], sizes = [1, 128], strides = [1, 1]} : vector<1x256xf32> to vector<1x128xf32>
      %242 = vector.extract_strided_slice %93 {offsets = [0, 27], sizes = [1, 128], strides = [1, 1]} : vector<1x256xf32> to vector<1x128xf32>
      %243 = vector.extract_strided_slice %93 {offsets = [0, 26], sizes = [1, 128], strides = [1, 1]} : vector<1x256xf32> to vector<1x128xf32>
      %244 = vector.extract_strided_slice %93 {offsets = [0, 25], sizes = [1, 128], strides = [1, 1]} : vector<1x256xf32> to vector<1x128xf32>
      %245 = vector.extract_strided_slice %93 {offsets = [0, 24], sizes = [1, 128], strides = [1, 1]} : vector<1x256xf32> to vector<1x128xf32>
      %246 = tpu.concatenate %238, %239, %240, %241, %242, %243, %244, %245 in 0 : vector<1x128xf32>, vector<1x128xf32>, vector<1x128xf32>, vector<1x128xf32>, vector<1x128xf32>, vector<1x128xf32>, vector<1x128xf32>, vector<1x128xf32> -> vector<8x128xf32>
      %c0_57 = arith.constant 0 : index
      %c96 = arith.constant 96 : index
      %c0_58 = arith.constant 0 : index
      %247 = vector.load %arg2[%c0_57, %c96, %c0_58] : memref<1x128x128xf32, #tpu.memory_space<vmem>>, vector<1x8x128xf32>
      %248 = vector.shape_cast %247 : vector<1x8x128xf32> to vector<8x128xf32>
      %249 = vector.shape_cast %246 : vector<8x128xf32> to vector<1x8x128xf32>
      tpu.vector_store %arg2[%c0_57, %c96, %c0_58], %249 {strides = array<i32>} : memref<1x128x128xf32, #tpu.memory_space<vmem>>, vector<1x8x128xf32>,
      %250 = vector.extract_strided_slice %93 {offsets = [0, 23], sizes = [1, 128], strides = [1, 1]} : vector<1x256xf32> to vector<1x128xf32>
      %251 = vector.extract_strided_slice %93 {offsets = [0, 22], sizes = [1, 128], strides = [1, 1]} : vector<1x256xf32> to vector<1x128xf32>
      %252 = vector.extract_strided_slice %93 {offsets = [0, 21], sizes = [1, 128], strides = [1, 1]} : vector<1x256xf32> to vector<1x128xf32>
      %253 = vector.extract_strided_slice %93 {offsets = [0, 20], sizes = [1, 128], strides = [1, 1]} : vector<1x256xf32> to vector<1x128xf32>
      %254 = vector.extract_strided_slice %93 {offsets = [0, 19], sizes = [1, 128], strides = [1, 1]} : vector<1x256xf32> to vector<1x128xf32>
      %255 = vector.extract_strided_slice %93 {offsets = [0, 18], sizes = [1, 128], strides = [1, 1]} : vector<1x256xf32> to vector<1x128xf32>
      %256 = vector.extract_strided_slice %93 {offsets = [0, 17], sizes = [1, 128], strides = [1, 1]} : vector<1x256xf32> to vector<1x128xf32>
      %257 = vector.extract_strided_slice %93 {offsets = [0, 16], sizes = [1, 128], strides = [1, 1]} : vector<1x256xf32> to vector<1x128xf32>
      %258 = tpu.concatenate %250, %251, %252, %253, %254, %255, %256, %257 in 0 : vector<1x128xf32>, vector<1x128xf32>, vector<1x128xf32>, vector<1x128xf32>, vector<1x128xf32>, vector<1x128xf32>, vector<1x128xf32>, vector<1x128xf32> -> vector<8x128xf32>
      %c0_59 = arith.constant 0 : index
      %c104 = arith.constant 104 : index
      %c0_60 = arith.constant 0 : index
      %259 = vector.load %arg2[%c0_59, %c104, %c0_60] : memref<1x128x128xf32, #tpu.memory_space<vmem>>, vector<1x8x128xf32>
      %260 = vector.shape_cast %259 : vector<1x8x128xf32> to vector<8x128xf32>
      %261 = vector.shape_cast %258 : vector<8x128xf32> to vector<1x8x128xf32>
      tpu.vector_store %arg2[%c0_59, %c104, %c0_60], %261 {strides = array<i32>} : memref<1x128x128xf32, #tpu.memory_space<vmem>>, vector<1x8x128xf32>,
      %262 = vector.extract_strided_slice %93 {offsets = [0, 15], sizes = [1, 128], strides = [1, 1]} : vector<1x256xf32> to vector<1x128xf32>
      %263 = vector.extract_strided_slice %93 {offsets = [0, 14], sizes = [1, 128], strides = [1, 1]} : vector<1x256xf32> to vector<1x128xf32>
      %264 = vector.extract_strided_slice %93 {offsets = [0, 13], sizes = [1, 128], strides = [1, 1]} : vector<1x256xf32> to vector<1x128xf32>
      %265 = vector.extract_strided_slice %93 {offsets = [0, 12], sizes = [1, 128], strides = [1, 1]} : vector<1x256xf32> to vector<1x128xf32>
      %266 = vector.extract_strided_slice %93 {offsets = [0, 11], sizes = [1, 128], strides = [1, 1]} : vector<1x256xf32> to vector<1x128xf32>
      %267 = vector.extract_strided_slice %93 {offsets = [0, 10], sizes = [1, 128], strides = [1, 1]} : vector<1x256xf32> to vector<1x128xf32>
      %268 = vector.extract_strided_slice %93 {offsets = [0, 9], sizes = [1, 128], strides = [1, 1]} : vector<1x256xf32> to vector<1x128xf32>
      %269 = vector.extract_strided_slice %93 {offsets = [0, 8], sizes = [1, 128], strides = [1, 1]} : vector<1x256xf32> to vector<1x128xf32>
      %270 = tpu.concatenate %262, %263, %264, %265, %266, %267, %268, %269 in 0 : vector<1x128xf32>, vector<1x128xf32>, vector<1x128xf32>, vector<1x128xf32>, vector<1x128xf32>, vector<1x128xf32>, vector<1x128xf32>, vector<1x128xf32> -> vector<8x128xf32>
      %c0_61 = arith.constant 0 : index
      %c112 = arith.constant 112 : index
      %c0_62 = arith.constant 0 : index
      %271 = vector.load %arg2[%c0_61, %c112, %c0_62] : memref<1x128x128xf32, #tpu.memory_space<vmem>>, vector<1x8x128xf32>
      %272 = vector.shape_cast %271 : vector<1x8x128xf32> to vector<8x128xf32>
      %273 = vector.shape_cast %270 : vector<8x128xf32> to vector<1x8x128xf32>
      tpu.vector_store %arg2[%c0_61, %c112, %c0_62], %273 {strides = array<i32>} : memref<1x128x128xf32, #tpu.memory_space<vmem>>, vector<1x8x128xf32>,
      %274 = vector.extract_strided_slice %93 {offsets = [0, 7], sizes = [1, 128], strides = [1, 1]} : vector<1x256xf32> to vector<1x128xf32>
      %275 = vector.extract_strided_slice %93 {offsets = [0, 6], sizes = [1, 128], strides = [1, 1]} : vector<1x256xf32> to vector<1x128xf32>
      %276 = vector.extract_strided_slice %93 {offsets = [0, 5], sizes = [1, 128], strides = [1, 1]} : vector<1x256xf32> to vector<1x128xf32>
      %277 = vector.extract_strided_slice %93 {offsets = [0, 4], sizes = [1, 128], strides = [1, 1]} : vector<1x256xf32> to vector<1x128xf32>
      %278 = vector.extract_strided_slice %93 {offsets = [0, 3], sizes = [1, 128], strides = [1, 1]} : vector<1x256xf32> to vector<1x128xf32>
      %279 = vector.extract_strided_slice %93 {offsets = [0, 2], sizes = [1, 128], strides = [1, 1]} : vector<1x256xf32> to vector<1x128xf32>
      %280 = vector.extract_strided_slice %93 {offsets = [0, 1], sizes = [1, 128], strides = [1, 1]} : vector<1x256xf32> to vector<1x128xf32>
      %281 = vector.extract_strided_slice %93 {offsets = [0, 0], sizes = [1, 128], strides = [1, 1]} : vector<1x256xf32> to vector<1x128xf32>
      %282 = tpu.concatenate %274, %275, %276, %277, %278, %279, %280, %281 in 0 : vector<1x128xf32>, vector<1x128xf32>, vector<1x128xf32>, vector<1x128xf32>, vector<1x128xf32>, vector<1x128xf32>, vector<1x128xf32>, vector<1x128xf32> -> vector<8x128xf32>
      %c0_63 = arith.constant 0 : index
      %c120 = arith.constant 120 : index
      %c0_64 = arith.constant 0 : index
      %283 = vector.load %arg2[%c0_63, %c120, %c0_64] : memref<1x128x128xf32, #tpu.memory_space<vmem>>, vector<1x8x128xf32>
      %284 = vector.shape_cast %283 : vector<1x8x128xf32> to vector<8x128xf32>
      %285 = vector.shape_cast %282 : vector<8x128xf32> to vector<1x8x128xf32>
      tpu.vector_store %arg2[%c0_63, %c120, %c0_64], %285 {strides = array<i32>} : memref<1x128x128xf32, #tpu.memory_space<vmem>>, vector<1x8x128xf32>,
    } else {
    }
    return
  }
  func.func @transform_0(%arg0: i32) -> (i32, i32) {
    %c0_i32 = arith.constant 0 : i32
    %c0_i32_0 = arith.constant 0 : i32
    %c0_i32_1 = arith.constant 0 : i32
    return %c0_i32, %c0_i32_0 : i32, i32
  }
  func.func @transform_1(%arg0: i32) -> (i32, i32, i32) {
    %c0_i32 = arith.constant 0 : i32
    %c0_i32_0 = arith.constant 0 : i32
    %c0_i32_1 = arith.constant 0 : i32
    return %arg0, %c0_i32, %c0_i32_0 : i32, i32, i32
  }
}

module attributes {stable_mosaic.version = 11 : i64} {
  func.func @kernel(%arg0: i32, %arg1: i32, %arg2: memref<8x128xf32, #tpu.memory_space<vmem>>, %arg3: memref<1x128x128xf32, #tpu.memory_space<vmem>>, %arg4: memref<8x128xf32, #tpu.memory_space<vmem>>, %arg5: memref<8x128xf32, #tpu.memory_space<vmem>>) attributes {dimension_semantics = [#tpu.dimension_semantics<parallel>, #tpu.dimension_semantics<arbitrary>], iteration_bounds = array<i64: 1, 1>, scalar_prefetch = 0 : i64, scratch_operands = 1 : i64, tpu.core_type = #tpu.core_type<tc>, window_params = [{pipeline_mode = #tpu.pipeline_mode<synchronous>, transform_indices = @transform_0, window_bounds = array<i64: 8, 128>}, {transform_indices = @transform_1, window_bounds = array<i64: 1, 128, 128>}, {transform_indices = @transform_2, window_bounds = array<i64: 8, 128>}]} {
    %c0_i32 = arith.constant 0 : i32
    %0 = arith.cmpi eq, %arg1, %c0_i32 : i32
    %1 = arith.extui %0 : i1 to i32
    %c0_i32_0 = arith.constant 0 : i32
    %2 = arith.cmpi ne, %1, %c0_i32_0 : i32
    scf.if %2 {
      %cst = arith.constant 0.000000e+00 : f32
      %19 = vector.broadcast %cst : f32 to vector<8x128xf32>
      %c0_8 = arith.constant 0 : index
      %c0_9 = arith.constant 0 : index
      %20 = vector.load %arg5[%c0_8, %c0_9] : memref<8x128xf32, #tpu.memory_space<vmem>>, vector<8x128xf32>
      tpu.vector_store %arg5[%c0_8, %c0_9], %19 {strides = array<i32>} : memref<8x128xf32, #tpu.memory_space<vmem>>, vector<8x128xf32>,
    } else {
    }
    %c128_i32 = arith.constant 128 : i32
    %3 = arith.muli %arg1, %c128_i32 : i32
    %4 = tpu.assume_multiple %3, 128 : i32
    %c0 = arith.constant 0 : index
    %5 = arith.index_cast %4 : i32 to index
    %6 = vector.load %arg2[%c0, %5] : memref<8x128xf32, #tpu.memory_space<vmem>>, vector<8x128xf32>
    %c0_i32_1 = arith.constant 0 : i32
    %7 = arith.subi %c0_i32_1, %arg1 : i32
    %c1_i32 = arith.constant 1 : i32
    %8 = arith.muli %arg0, %c1_i32 : i32
    %9 = arith.addi %7, %8 : i32
    %c0_i32_2 = arith.constant 0 : i32
    %10 = arith.addi %9, %c0_i32_2 : i32
    %c0_i32_3 = arith.constant 0 : i32
    %11 = arith.cmpi sge, %10, %c0_i32_3 : i32
    %c0_i32_4 = arith.constant 0 : i32
    %12 = arith.cmpi sle, %10, %c0_i32_4 : i32
    %13 = arith.andi %11, %12 : i1
    %14 = arith.extui %13 : i1 to i32
    %c0_i32_5 = arith.constant 0 : i32
    %15 = arith.cmpi ne, %14, %c0_i32_5 : i32
    scf.if %15 {
      %c0_8 = arith.constant 0 : index
      %c0_9 = arith.constant 0 : index
      %19 = vector.load %arg5[%c0_8, %c0_9] : memref<8x128xf32, #tpu.memory_space<vmem>>, vector<8x128xf32>
      %c0_10 = arith.constant 0 : index
      %c0_11 = arith.constant 0 : index
      %c0_12 = arith.constant 0 : index
      %20 = vector.load %arg3[%c0_10, %c0_11, %c0_12] : memref<1x128x128xf32, #tpu.memory_space<vmem>>, vector<1x128x128xf32>
      %21 = vector.shape_cast %20 : vector<1x128x128xf32> to vector<128x128xf32>
      %cst = arith.constant dense<0.000000e+00> : vector<8x128xf32>
      %22 = tpu.matmul %6, %21, %cst {dimension_numbers = #tpu.dot_dimension_numbers<[1], [0], [0], [1], [0, 0, 1, 1], [], []>} : vector<8x128xf32>, vector<128x128xf32>, vector<8x128xf32> -> vector<8x128xf32>
      %23 = arith.addf %19, %22 : vector<8x128xf32>
      %c0_13 = arith.constant 0 : index
      %c0_14 = arith.constant 0 : index
      %24 = vector.load %arg5[%c0_13, %c0_14] : memref<8x128xf32, #tpu.memory_space<vmem>>, vector<8x128xf32>
      tpu.vector_store %arg5[%c0_13, %c0_14], %23 {strides = array<i32>} : memref<8x128xf32, #tpu.memory_space<vmem>>, vector<8x128xf32>,
    } else {
    }
    %c0_i32_6 = arith.constant 0 : i32
    %16 = arith.cmpi eq, %arg1, %c0_i32_6 : i32
    %17 = arith.extui %16 : i1 to i32
    %c0_i32_7 = arith.constant 0 : i32
    %18 = arith.cmpi ne, %17, %c0_i32_7 : i32
    scf.if %18 {
      %c0_8 = arith.constant 0 : index
      %c0_9 = arith.constant 0 : index
      %19 = vector.load %arg5[%c0_8, %c0_9] : memref<8x128xf32, #tpu.memory_space<vmem>>, vector<8x128xf32>
      %c0_10 = arith.constant 0 : index
      %c0_11 = arith.constant 0 : index
      %20 = vector.load %arg4[%c0_10, %c0_11] : memref<8x128xf32, #tpu.memory_space<vmem>>, vector<8x128xf32>
      tpu.vector_store %arg4[%c0_10, %c0_11], %19 {strides = array<i32>} : memref<8x128xf32, #tpu.memory_space<vmem>>, vector<8x128xf32>,
    } else {
    }
    return
  }
  func.func @transform_0(%arg0: i32, %arg1: i32) -> (i32, i32) {
    %c0_i32 = arith.constant 0 : i32
    %c0_i32_0 = arith.constant 0 : i32
    %c0_i32_1 = arith.constant 0 : i32
    return %c0_i32, %c0_i32_0 : i32, i32
  }
  func.func @transform_1(%arg0: i32, %arg1: i32) -> (i32, i32, i32) {
    %c0_i32 = arith.constant 0 : i32
    %0 = arith.subi %c0_i32, %arg1 : i32
    %c1_i32 = arith.constant 1 : i32
    %1 = arith.muli %arg0, %c1_i32 : i32
    %2 = arith.addi %0, %1 : i32
    %c0_i32_0 = arith.constant 0 : i32
    %3 = arith.addi %2, %c0_i32_0 : i32
    %c0_i32_1 = arith.constant 0 : i32
    %c0_i32_2 = arith.constant 0 : i32
    %c0_i32_3 = arith.constant 0 : i32
    return %3, %c0_i32_1, %c0_i32_2 : i32, i32, i32
  }
  func.func @transform_2(%arg0: i32, %arg1: i32) -> (i32, i32) {
    %c0_i32 = arith.constant 0 : i32
    %c0_i32_0 = arith.constant 0 : i32
    return %c0_i32, %arg0 : i32, i32
  }
}

</mosaic_0001>

<bundles_post_ra>
// kernel: lti_forward.3
= control target key start
LH: loop header
LB: loop body
LE: loop exit
PB: predicated region body
PF: predicated region fallthrough
CT: control target
= control target key end

     0   :  { %v213_v0 = vmov 0.0   ;;  %vm214_vm0 = vmmov 0   ;;  %s284_s1 = inlined_call_operand.vmem [shape: f32[1,128,128], index: 1, kind: input, shape index: {}]   ;;  %s285_s0 = inlined_call_operand.vmem [shape: f32[8,128], index: 0, kind: input, shape index: {}]   ;;  %s286_s2 = inlined_call_operand.vmem [shape: f32[8,128], index: 2, kind: output, shape index: {}]  }
   0x1   :  { %176 = vmatprep.subr.mxu0 %v213_v0  ;;  %v70_v1 = vld [vmem:[%s284_s1 + $0x78] sm:$0xff]  ;;  %v69_v2 = vld [vmem:[%s284_s1 + $0x70] sm:$0xff]  ;;  %208 = vmatprep.mubr.msk.f32.mxu0 %vm214_vm0, %v213_v0  ;;  %v68_v3 = vld [vmem:[%s284_s1 + $0x68] sm:$0xff] }
   0x2   :  { %177 = vmatpush3.msra.mxu0 %v70_v1  ;;  %v67_v4 = vld [vmem:[%s284_s1 + $0x60] sm:$0xff]  ;;  %v66_v5 = vld [vmem:[%s284_s1 + $0x58] sm:$0xff]  ;;  %v65_v6 = vld [vmem:[%s284_s1 + $0x50] sm:$0xff] }
   0x3   :  { %178 = vmatprep.subr.mxu0 %v213_v0  ;;  %v64_v7 = vld [vmem:[%s284_s1 + $0x48] sm:$0xff]  ;;  %v63_v8 = vld [vmem:[%s284_s1 + $0x40] sm:$0xff]  ;;  %v62_v9 = vld [vmem:[%s284_s1 + $0x38] sm:$0xff] }
   0x4   :  { %179 = vmatpush3.msra.mxu0 %v69_v2  ;;  %v61_v10 = vld [vmem:[%s284_s1 + $0x30] sm:$0xff]  ;;  %v60_v11 = vld [vmem:[%s284_s1 + $0x28] sm:$0xff]  ;;  %v59_v12 = vld [vmem:[%s284_s1 + $0x20] sm:$0xff] }
   0x5   :  { %180 = vmatprep.subr.mxu0 %v213_v0  ;;  %v58_v13 = vld [vmem:[%s284_s1 + $0x18] sm:$0xff]  ;;  %v57_v14 = vld [vmem:[%s284_s1 + $0x10] sm:$0xff]  ;;  %v56_v15 = vld [vmem:[%s284_s1 + $0x8] sm:$0xff] }
   0x6   :  { %181 = vmatpush3.msra.mxu0 %v68_v3  ;;  %v55_v16 = vld [vmem:[%s284_s1] sm:$0xff] }
   0x7   :  { %182 = vmatprep.subr.mxu0 %v213_v0  ;;  %v45_v17 = vld [vmem:[%s285_s0] sm:$0xff] }
   0x8   :  { %183 = vmatpush3.msra.mxu0 %v67_v4 }
   0x9   :  { %184 = vmatprep.subr.mxu0 %v213_v0 }
   0xa   :  { %185 = vmatpush3.msra.mxu0 %v66_v5 }
   0xb   :  { %186 = vmatprep.subr.mxu0 %v213_v0 }
   0xc   :  { %187 = vmatpush3.msra.mxu0 %v65_v6 }
   0xd   :  { %188 = vmatprep.subr.mxu0 %v213_v0 }
   0xe   :  { %189 = vmatpush3.msra.mxu0 %v64_v7 }
   0xf   :  { %190 = vmatprep.subr.mxu0 %v213_v0 }
  0x10   :  { %191 = vmatpush3.msra.mxu0 %v63_v8 }
  0x11   :  { %192 = vmatprep.subr.mxu0 %v213_v0 }
  0x12   :  { %193 = vmatpush3.msra.mxu0 %v62_v9 }
  0x13   :  { %194 = vmatprep.subr.mxu0 %v213_v0 }
  0x14   :  { %195 = vmatpush3.msra.mxu0 %v61_v10 }
  0x15   :  { %196 = vmatprep.subr.mxu0 %v213_v0 }
  0x16   :  { %197 = vmatpush3.msra.mxu0 %v60_v11 }
  0x17   :  { %198 = vmatprep.subr.mxu0 %v213_v0 }
  0x18   :  { %199 = vmatpush3.msra.mxu0 %v59_v12 }
  0x19   :  { %200 = vmatprep.subr.mxu0 %v213_v0 }
  0x1a   :  { %201 = vmatpush3.msra.mxu0 %v58_v13 }
  0x1b   :  { %202 = vmatprep.subr.mxu0 %v213_v0 }
  0x1c   :  { %203 = vmatpush3.msra.mxu0 %v57_v14 }
  0x1d   :  { %204 = vmatprep.subr.mxu0 %v213_v0 }
  0x1e   :  { %205 = vmatpush3.msra.mxu0 %v56_v15 }
  0x1f   :  { %206 = vmatprep.subr.mxu0 %v213_v0 }
  0x20   :  { %207 = vmatpush3.msra.mxu0 %v55_v16 }
  0x21   :  { %209 = vmatmul.mubr.f32.vlgmr.msra.gmra.mxu0 %v45_v17 }
  0xe1   :  { %v137_v18 = vpop.f32.mrf.mxu0 }
  0xe2   :  { %147 = vst [vmem:[%s286_s2] sm:$0xff] %v137_v18 }
  0xe3   :  { %v210_v19 = vpop.f32.mrf.mxu0 }

// kernel: lti_forward.2
= control target key start
LH: loop header
LB: loop body
LE: loop exit
PB: predicated region body
PF: predicated region fallthrough
CT: control target
= control target key end

     0   :  { %6 = vsyncpa [#allocation3], 0  ;;  %s2745_s0 = inlined_call_operand.vmem [shape: f32[3,5], index: 0, kind: input, shape index: {}]   ;;  %s2746_s1 = inlined_call_operand.vmem [shape: f32[1,128,128], index: 1, kind: output, shape index: {}]  }
   0x1   :  { %s13_s8 = sshll.u32 %s2745_s0, 4  ;;  %s14_s8 = int_to_ptr.vmem [resolvable:$true] %s13_s8 }
   0x2   :  { %s1603_s9 = scalar_lea.vmem %s14_s8, 64  ;;  %p1608_p1 = scmp.lt.s32.totalorder %s14_s8, %s14_s8 }
   0x3   :  { %p1604_p0 = scmp.ne.s32.totalorder %s14_s8, %s1603_s9  ;;  %p1609_p2 = scmp.lt.s32.totalorder %s1603_s9, %s1603_s9 }
   0x5   :  { %p1610_p3 = por %p1609_p2, %p1608_p1 }
   0x7   :  { %p1611_p4 = pnand %p1610_p3, %p1604_p0 }
   0x9   :  { %1614 = shalt.err (!%p1611_p4)
}
   0xa   :  { %s1617_s10 = smov [#allocation2]  }
   0xb   :  { %16 = dma.vmem_to_smem %s14_s8, 64, %s1617_s10, [#allocation3]  }
   0xc   :  { %1615 = dma.done.wait [#allocation3], 64  }
   0xd   :  { %1616 = vsyncadd [#allocation3], 4294967232 }
   0xe   :  { %20 = sfence }
   0xf   :  { %v27_v0 = vlaneseq  ;;  %s1659_s11 = sld [smem:[#allocation2 + $0x80]]  ;;  %v1618_v31 = vmov 683565275   ;;  %v1619_v33 = vmov 2475754826   ;;  %s1624_s25 = smov 2  }
  0x10   :  { %s1666_s0 = sld [smem:[#allocation2 + $0x81]]  ;;  %v1620_v35 = vmov 2131351028   ;;  %v1621_v37 = vmov 2102212464   ;;  %s1625_s26 = smov 1  }
  0x11   :  { %v1661_v1 = vand.u32 127, %v27_v0  ;;  %s1679_s12 = sld [smem:[#allocation2 + $0x82]]  ;;  %v1622_v39 = vmov 920167782   ;;  %v1623_v47 = vmov 1326507024  }
  0x12   :  { %s1777_s13 = sld [smem:[#allocation2 + $0x83]]  ;;  %s1626_s27 = smov 3  }
  0x13   :  { %v1664_v2 = vsub.s32 134, %v1661_v1  ;;  %s1797_s14 = sld [smem:[#allocation2]]  ;;  %s1627_s28 = smov 4  }
  0x14   :  { %s1803_s15 = sld [smem:[#allocation2 + $0x1]]  ;;  %s1628_s29 = smov 5  }
  0x15   :  { %vm46_vm0 = vcmp.lt.s32.totalorder %v1664_v2, 15  ;;  %v67_v5 = vstv %s1659_s11  ;;  %s1830_s16 = sld [smem:[#allocation2 + $0x2]]  ;;  %s1629_s30 = smov 6  }
  0x16   :  { %v47_v3 = vsel %vm46_vm0, %v1664_v2, 15  ;;  %v293_v7 = vstv %s1666_s0  ;;  %s1843_s17 = sld [smem:[#allocation2 + $0x100]]  ;;  %s1630_s2 = smov 7  }
  0x17   :  { %v50_v4 = vcvt.s32.f32 %v47_v3  ;;  %v2755_v19 = vstv %s1679_s12  ;;  %s1848_s18 = sld [smem:[#allocation2 + $0x101]]  ;;  %s1631_s3 = smov 9  }
  0x18   :  { %s1853_s19 = sld [smem:[#allocation2 + $0x102]]  ;;  %s1632_s4 = smov 17  }
  0x19   :  { %v1671_v6 = vmul.f32 0.06666667, %v50_v4  ;;  %s1856_s20 = sld [smem:[#allocation2 + $0x84]]  ;;  %s1633_s5 = smov 25  }
  0x1a   :  { %s1879_s21 = sld [smem:[#allocation2 + $0x3]]  ;;  %s1634_s6 = smov 33  }
  0x1b   :  { %v1677_v8 = vmul.f32 %v67_v5, %v1671_v6  ;;  %v1684_v9 = vmul.f32 %v293_v7, %v1671_v6  ;;  %v1698_v25 = vmul.f32 %v2755_v19, %v1671_v6  ;;  %s1898_s22 = sld [smem:[#allocation2 + $0x103]]  ;;  %s1635_s7 = smov 41  }
  0x1c   :  { %s1929_s23 = sld [smem:[#allocation2 + $0x4]]  ;;  %s1636_s8 = smov 49  }
  0x1d   :  { %v70_v10 = vand.u32 2147483647, %v1677_v8  ;;  %v73_v11 = vand.u32 2139095040, %v1677_v8  ;;  %v296_v14 = vand.u32 2147483647, %v1684_v9  ;;  %v299_v15 = vand.u32 2139095040, %v1684_v9 }
  0x1e   :  { %v525_v41 = vand.u32 2139095040, %v1698_v25  ;;  %s2318_s24 = sld [smem:[#allocation2 + $0x104]]  ;;  %s1637_s9 = smov 57  }
  0x1f   :  { %v74_v12 = vshrl.u32 %v73_v11, 23  ;;  %v77_v13 = vand.u32 8388607, %v70_v10  ;;  %v300_v17 = vshrl.u32 %v299_v15, 23  ;;  %v303_v22 = vand.u32 8388607, %v296_v14 }
  0x20   :  { %v526_v15 = vshrl.u32 %v525_v41, 23  ;;  %s1638_s10 = smov 65   ;;  %s1639_s11 = smov 73  }
  0x21   :  { %v1422_v16 = vadd.s32 4294967169, %v74_v12  ;;  %v78_v20 = vor.u32 8388608, %v77_v13  ;;  %v1433_v21 = vadd.s32 4294967169, %v300_v17  ;;  %v304_v29 = vor.u32 8388608, %v303_v22  ;;  %s1640_s0 = smov 81  }
  0x23   :  { %v80_v18 = vadd.s32 1, %v1422_v16  ;;  %v306_v24 = vadd.s32 1, %v1433_v21  ;;  %v1700_v28 = vshll.u32 %v78_v20, 8  ;;  %v1715_v62 = vshll.u32 %v304_v29, 8 }
  0x25   :  { %vm81_vm1 = vcmp.gt.s32.totalorder %v80_v18, 0  ;;  %vm307_vm2 = vcmp.gt.s32.totalorder %v306_v24, 0 }
  0x26   :  { %v82_v23 = vsel %vm81_vm1, %v80_v18, 0  ;;  %v308_v54 = vsel %vm307_vm2, %v306_v24, 0 }
  0x27   :  { %v84_v26 = vand.u32 31, %v82_v23  ;;  %v83_v27 = vshrl.u32 %v82_v23, 5  ;;  %v309_v3 = vshrl.u32 %v308_v54, 5  ;;  %v310_v4 = vand.u32 31, %v308_v54 }
  0x29   :  { %v85_v30 = vsub.s32 32, %v84_v26  ;;  %v87_v32 = vshll.u32 %v1618_v31, %v84_v26  ;;  %v90_v34 = vshll.u32 %v1619_v33, %v84_v26  ;;  %v93_v36 = vshll.u32 %v1620_v35, %v84_v26 }
  0x2a   :  { %v96_v38 = vshll.u32 %v1621_v37, %v84_v26  ;;  %v99_v40 = vshll.u32 %v1622_v39, %v84_v26  ;;  %vm102_vm3 = vcmp.lt.s32.totalorder %v83_v27, 1  ;;  %vm103_vm4 = vcmp.lt.s32.totalorder %v83_v27, 2 }
  0x2b   :  { %v86_v42 = vshrl.u32 %v1618_v31, %v85_v30  ;;  %v88_v43 = vshrl.u32 %v1619_v33, %v85_v30  ;;  %v91_v44 = vshrl.u32 %v1620_v35, %v85_v30  ;;  %v94_v45 = vshrl.u32 %v1621_v37, %v85_v30 }
  0x2c   :  { %v97_v46 = vshrl.u32 %v1622_v39, %v85_v30  ;;  %v100_v48 = vshrl.u32 %v1623_v47, %v85_v30  ;;  %vm105_vm5 = vcmp.lt.s32.totalorder %v83_v27, 4  ;;  %vm104_vm6 = vcmp.lt.s32.totalorder %v83_v27, 3 }
  0x2d   :  { %v89_v49 = vor.u32 %v88_v43, %v87_v32  ;;  %v92_v50 = vor.u32 %v91_v44, %v90_v34  ;;  %v95_v51 = vor.u32 %v94_v45, %v93_v36  ;;  %v311_v21 = vsub.s32 32, %v310_v4 }
  0x2e   :  { %v98_v52 = vor.u32 %v97_v46, %v96_v38  ;;  %v101_v53 = vor.u32 %v100_v48, %v99_v40  ;;  %v313_v22 = vshll.u32 %v1618_v31, %v310_v4  ;;  %v316_v23 = vshll.u32 %v1619_v33, %v310_v4 }
  0x2f   :  { %v106_v55 = vsel %vm102_vm3, %v86_v42, %v89_v49  ;;  %v107_v56 = vsel %vm105_vm5, %v95_v51, 2102212464  ;;  %v110_v57 = vsel %vm102_vm3, %v89_v49, %v92_v50  ;;  %v114_v58 = vsel %vm102_vm3, %v92_v50, %v95_v51 }
  0x30   :  { %v108_v59 = vsel %vm104_vm6, %v92_v50, %v107_v56  ;;  %v111_v60 = vsel %vm105_vm5, %v98_v52, 920167782  ;;  %v115_v61 = vsel %vm105_vm5, %v101_v53, 1326507024  ;;  %v319_v24 = vshll.u32 %v1620_v35, %v310_v4 }
  0x31   :  { %v112_v63 = vsel %vm104_vm6, %v95_v51, %v111_v60  ;;  %v116_v0 = vsel %vm104_vm6, %v98_v52, %v115_v61  ;;  %v109_v11 = vsel %vm103_vm4, %v106_v55, %v108_v59  ;;  %v322_v27 = vshll.u32 %v1621_v37, %v310_v4 }
  0x32   :  { %v113_v12 = vsel %vm103_vm4, %v110_v57, %v112_v63  ;;  %v117_v13 = vsel %vm103_vm4, %v114_v58, %v116_v0  ;;  %v125_v26 = vmul.u32 %v1700_v28, %v109_v11  ;;  %v325_v29 = vshll.u32 %v1622_v39, %v310_v4 }
  0x33   :  { %v1721_v16 = vmul.u32.u64.low %v1700_v28, %v117_v13  ;;  %v1722_v17 = vmul.u32.u64.high %v1700_v28, %v117_v13, %v1721_v16  ;;  %v1725_v18 = vmul.u32.u64.low %v1700_v28, %v113_v12  ;;  %v1726_v20 = vmul.u32.u64.high %v1700_v28, %v113_v12, %v1725_v18 }
  0x34   :  { %vm328_vm7 = vcmp.lt.s32.totalorder %v309_v3, 1  ;;  %v312_v30 = vshrl.u32 %v1618_v31, %v311_v21  ;;  %v314_v32 = vshrl.u32 %v1619_v33, %v311_v21  ;;  %v317_v34 = vshrl.u32 %v1620_v35, %v311_v21 }
  0x35   :  { %v320_v36 = vshrl.u32 %v1621_v37, %v311_v21  ;;  %vm127_vm8 = vc.u32 %v1722_v17, %v1725_v18  ;;  %v128_v38 = vadd.s32 1, %v1726_v20  ;;  %v323_v28 = vshrl.u32 %v1622_v39, %v311_v21 }
  0x36   :  { %vm329_vm9 = vcmp.lt.s32.totalorder %v309_v3, 2  ;;  %v315_v40 = vor.u32 %v314_v32, %v313_v22  ;;  %v318_v41 = vor.u32 %v317_v34, %v316_v23  ;;  %v326_v43 = vshrl.u32 %v1623_v47, %v311_v21 }
  0x37   :  { %v321_v42 = vor.u32 %v320_v36, %v319_v24  ;;  %v129_v44 = vsel %vm127_vm8, %v128_v38, %v1726_v20  ;;  %v324_v45 = vor.u32 %v323_v28, %v322_v27  ;;  %vm330_vm10 = vcmp.lt.s32.totalorder %v309_v3, 3 }
  0x38   :  { %vm331_vm11 = vcmp.lt.s32.totalorder %v309_v3, 4  ;;  %v130_v46 = vadd.s32 %v129_v44, %v125_v26  ;;  %v327_v48 = vor.u32 %v326_v43, %v325_v29  ;;  %v332_v49 = vsel %vm328_vm7, %v312_v30, %v315_v40 }
  0x39   :  { %v333_v50 = vsel %vm331_vm11, %v321_v42, 2102212464  ;;  %v336_v52 = vsel %vm328_vm7, %v315_v40, %v318_v41  ;;  %v337_v53 = vsel %vm331_vm11, %v324_v45, 920167782  ;;  %v340_v54 = vsel %vm328_vm7, %v318_v41, %v321_v42 }
  0x3a   :  { %v334_v51 = vsel %vm330_vm10, %v318_v41, %v333_v50  ;;  %v131_v55 = vadd.s32 536870912, %v130_v46  ;;  %v338_v56 = vsel %vm330_vm10, %v321_v42, %v337_v53  ;;  %v341_v57 = vsel %vm331_vm11, %v327_v48, 1326507024 }
  0x3b   :  { %v335_v58 = vsel %vm329_vm9, %v332_v49, %v334_v51  ;;  %v339_v59 = vsel %vm329_vm9, %v336_v52, %v338_v56  ;;  %v342_v60 = vsel %vm330_vm10, %v324_v45, %v341_v57  ;;  %v1444_v61 = vadd.s32 4294967169, %v526_v15 }
  0x3c   :  { %v1750_v63 = vshrl.u32 %v131_v55, 30  ;;  %v343_v0 = vsel %vm329_vm9, %v340_v54, %v342_v60  ;;  %v1754_v4 = vmul.u32.u64.low %v1715_v62, %v339_v59  ;;  %v1755_v11 = vmul.u32.u64.high %v1715_v62, %v339_v59, %v1754_v4 }
  0x3d   :  { %v1759_v12 = vmul.u32.u64.low %v1715_v62, %v343_v0  ;;  %v1760_v13 = vmul.u32.u64.high %v1715_v62, %v343_v0, %v1759_v12  ;;  %v532_v16 = vadd.s32 1, %v1444_v61  ;;  %v351_v21 = vmul.u32 %v1715_v62, %v335_v58 }
  0x3e   :  { %v133_v20 = vshll.u32 %v1750_v63, 30  ;;  %v354_v3 = vadd.s32 1, %v1755_v11  ;;  %v522_v23 = vand.u32 2147483647, %v1698_v25  ;;  %v29_v60 = vadd.s32 128, %v1661_v1 }
  0x3f   :  { %vm533_vm12 = vcmp.gt.s32.totalorder %v532_v16, 0  ;;  %vm353_vm13 = vc.u32 %v1760_v13, %v1754_v4  ;;  %vm72_vm8 = vcmp.lt.s32.totalorder %v1677_v8, 0 }
  0x40   :  { %v1764_v15 = vsub.s32 %v130_v46, %v133_v20  ;;  %v534_v22 = vsel %vm533_vm12, %v532_v16, 0  ;;  %v355_v26 = vsel %vm353_vm13, %v354_v3, %v1755_v11  ;;  %v529_v32 = vand.u32 8388607, %v522_v23 }
  0x41   :  { %v536_v27 = vand.u32 31, %v534_v22  ;;  %v356_v29 = vadd.s32 %v355_v26, %v351_v21  ;;  %v535_v38 = vshrl.u32 %v534_v22, 5  ;;  %v2754_v20 = vstv %s1777_s13 }
  0x42   :  { %v136_v24 = vsub.s32 0, %v1764_v15  ;;  %v530_v53 = vor.u32 8388608, %v529_v32  ;;  %vm298_vm12 = vcmp.lt.s32.totalorder %v1684_v9, 0  ;;  %vm1909_vm13 = vcmp.le.f32.partialorder %v70_v10, 0.7853982 }
  0x43   :  { %v357_v62 = vadd.s32 536870912, %v356_v29  ;;  %v537_v34 = vsub.s32 32, %v536_v27  ;;  %v539_v28 = vshll.u32 %v1618_v31, %v536_v27  ;;  %v542_v40 = vshll.u32 %v1619_v33, %v536_v27 }
  0x44   :  { %v1423_v30 = vmin.u32 %v136_v24, %v1764_v15  ;;  %v545_v44 = vshll.u32 %v1620_v35, %v536_v27  ;;  %v548_v48 = vshll.u32 %v1621_v37, %v536_v27  ;;  %v551_v51 = vshll.u32 %v1622_v39, %v536_v27 }
  0x45   :  { %v1779_v41 = vshrl.u32 %v357_v62, 30  ;;  %v540_v42 = vshrl.u32 %v1619_v33, %v537_v34  ;;  %v543_v43 = vshrl.u32 %v1620_v35, %v537_v34  ;;  %v546_v46 = vshrl.u32 %v1621_v37, %v537_v34 }
  0x46   :  { %v138_v36 = vclz %v1423_v30  ;;  %v549_v49 = vshrl.u32 %v1622_v39, %v537_v34  ;;  %v552_v52 = vshrl.u32 %v1623_v47, %v537_v34  ;;  %v538_v54 = vshrl.u32 %v1618_v31, %v537_v34 }
  0x47   :  { %v359_v50 = vshll.u32 %v1779_v41, 30  ;;  %v541_v56 = vor.u32 %v540_v42, %v539_v28  ;;  %v544_v57 = vor.u32 %v543_v43, %v542_v40  ;;  %v547_v58 = vor.u32 %v546_v46, %v545_v44 }
  0x48   :  { %v1424_v45 = vadd.s32 4294967294, %v138_v36  ;;  %v550_v59 = vor.u32 %v549_v49, %v548_v48  ;;  %vm554_vm15 = vcmp.lt.s32.totalorder %v535_v38, 1  ;;  %vm557_vm0 = vcmp.lt.s32.totalorder %v535_v38, 4 }
  0x49   :  { %v1791_v55 = vsub.s32 %v356_v29, %v359_v50  ;;  %v553_v11 = vor.u32 %v552_v52, %v551_v51  ;;  %v559_v12 = vsel %vm557_vm0, %v547_v58, 2102212464  ;;  %vm555_vm1 = vcmp.lt.s32.totalorder %v535_v38, 2 }
  0x4a   :  { %vm1425_vm14 = vcmp.lt.s32.totalorder %v1424_v45, 0  ;;  %vm556_vm2 = vcmp.lt.s32.totalorder %v535_v38, 3  ;;  %v570_v16 = vshll.u32 %v530_v53, 8  ;;  %v558_v3 = vsel %vm554_vm15, %v538_v54, %v541_v56 }
  0x4b   :  { %v141_v61 = vsel %vm1425_vm14, 0, %v1424_v45  ;;  %v362_v0 = vsub.s32 0, %v1791_v55  ;;  %v560_v22 = vsel %vm556_vm2, %v544_v57, %v559_v12  ;;  %v562_v1 = vsel %vm554_vm15, %v541_v56, %v544_v57 }
  0x4c   :  { %v146_v24 = vsub.s32 4294967266, %v141_v61  ;;  %v563_v26 = vsel %vm557_vm0, %v550_v59, 920167782  ;;  %v1806_v27 = vsub.s32 134, %v29_v60  ;;  %v566_v62 = vsel %vm554_vm15, %v544_v57, %v547_v58 }
  0x4d   :  { %v1434_v21 = vmin.u32 %v362_v0, %v1791_v55  ;;  %v564_v30 = vsel %vm556_vm2, %v547_v58, %v563_v26  ;;  %v567_v32 = vsel %vm557_vm0, %v553_v11, 1326507024  ;;  %v561_v34 = vsel %vm555_vm1, %v558_v3, %v560_v22 }
  0x4e   :  { %v565_v36 = vsel %vm555_vm1, %v562_v1, %v564_v30  ;;  %v568_v28 = vsel %vm556_vm2, %v550_v59, %v567_v32  ;;  %v1817_v40 = vmul.f32 %v2754_v20, %v1671_v6  ;;  %vm44_vm3 = vcmp.gt.s32.totalorder %v1806_v27, 0 }
  0x4f   :  { %v364_v29 = vclz %v1434_v21  ;;  %v569_v43 = vsel %vm555_vm1, %v566_v62, %v568_v28  ;;  %v1820_v44 = vmul.u32.u64.low %v570_v16, %v565_v36  ;;  %v1821_v45 = vmul.u32.u64.high %v570_v16, %v565_v36, %v1820_v44 }
  0x50   :  { %v1824_v46 = vmul.u32.u64.low %v570_v16, %v569_v43  ;;  %v1825_v48 = vmul.u32.u64.high %v570_v16, %v569_v43, %v1824_v46  ;;  %v126_v49 = vadd.s32 %v1725_v18, %v1722_v17  ;;  %v142_v50 = vsub.s32 32, %v141_v61 }
  0x51   :  { %v1435_v42 = vadd.s32 4294967294, %v364_v29  ;;  %v147_v51 = vadd.s32 127, %v146_v24  ;;  %v577_v38 = vmul.u32 %v570_v16, %v561_v34  ;;  %v751_v52 = vand.u32 2139095040, %v1817_v40 }
  0x52   :  { %v2752_v53 = vstv %s1797_s14  ;;  %v580_v56 = vadd.s32 1, %v1821_v45  ;;  %v143_v57 = vshll.u32 %v1764_v15, %v141_v61  ;;  %v2748_v58 = vstv %s1803_s15 }
  0x53   :  { %vm1436_vm4 = vcmp.lt.s32.totalorder %v1435_v42, 0  ;;  %vm579_vm5 = vc.u32 %v1825_v48, %v1820_v44  ;;  %v45_v17 = vsel %vm44_vm3, %v1806_v27, 0  ;;  %v144_v18 = vshrl.u32 %v126_v49, %v142_v50 }
  0x54   :  { %v367_v54 = vsel %vm1436_vm4, 0, %v1435_v42  ;;  %v148_v59 = vshll.u32 %v147_v51, 23  ;;  %v581_v60 = vsel %vm579_vm5, %v580_v56, %v1821_v45  ;;  %v752_v0 = vshrl.u32 %v751_v52, 23 }
  0x55   :  { %v372_v11 = vsub.s32 4294967266, %v367_v54  ;;  %v582_v12 = vadd.s32 %v581_v60, %v577_v38  ;;  %v58_v15 = vmul.f32 %v2752_v53, %v1671_v6  ;;  %v284_v16 = vmul.f32 %v2748_v58, %v1671_v6 }
  0x56   :  { %v1455_v61 = vadd.s32 4294967169, %v752_v0  ;;  %vm48_vm6 = vcmp.lt.s32.totalorder %v45_v17, 15  ;;  %v145_v3 = vor.u32 %v144_v18, %v143_v57  ;;  %v149_v22 = vor.u32 4788187, %v148_v59 }
  0x57   :  { %v583_v21 = vadd.s32 536870912, %v582_v12  ;;  %v2747_v1 = vstv %s1830_s16  ;;  %v352_v26 = vadd.s32 %v1754_v4, %v1760_v13  ;;  %v368_v29 = vsub.s32 32, %v367_v54 }
  0x58   :  { %v758_v24 = vadd.s32 1, %v1455_v61  ;;  %v373_v30 = vadd.s32 127, %v372_v11  ;;  %v60_v32 = vmul.f32 1.442695, %v58_v15  ;;  %v1862_v34 = vsel %vm48_vm6, %v45_v17, 15 }
  0x59   :  { %v1860_v62 = vshrl.u32 %v583_v21, 30  ;;  %v286_v36 = vmul.f32 1.442695, %v284_v16  ;;  %v510_v28 = vmul.f32 %v2747_v1, %v1671_v6  ;;  %v150_v45 = vand.u32 2147483647, %v149_v22 }
  0x5a   :  { %vm759_vm7 = vcmp.gt.s32.totalorder %v758_v24, 0  ;;  %v152_v46 = vcvt.s32.f32 %v145_v3  ;;  %v748_v4 = vand.u32 2147483647, %v1817_v40  ;;  %v369_v49 = vshll.u32 %v1791_v55, %v367_v54 }
  0x5b   :  { %v585_v42 = vshll.u32 %v1860_v62, 30  ;;  %v760_v43 = vsel %vm759_vm7, %v758_v24, 0  ;;  %v370_v50 = vshrl.u32 %v352_v26, %v368_v29  ;;  %v374_v51 = vshll.u32 %v373_v30, 23 }
  0x5c   :  { %v762_v13 = vand.u32 31, %v760_v43  ;;  %1543 = vpow2.f32 %v60_v32  ;;  %v2750_v52 = vstv %s1843_s17  ;;  %v2749_v57 = vstv %s1848_s18 }
  0x5d   :  { %v1870_v38 = vsub.s32 %v582_v12, %v585_v42  ;;  %1545 = vpow2.f32 %v286_v36  ;;  %v51_v18 = vcvt.s32.f32 %v1862_v34  ;;  %v1876_v59 = vmul.f32 %v152_v46, %v150_v45 }
  0x5e   :  { %v763_v56 = vsub.s32 32, %v762_v13  ;;  %v512_v60 = vmul.f32 1.442695, %v510_v28  ;;  %v516_v0 = vstv %s1853_s19  ;;  %v2753_v55 = vstv %s1856_s20 }
  0x5f   :  { %v588_v17 = vsub.s32 0, %v1870_v38  ;;  %v371_v54 = vor.u32 %v370_v50, %v369_v49  ;;  %v375_v11 = vor.u32 4788187, %v374_v51  ;;  %v755_v15 = vand.u32 8388607, %v748_v4 }
  0x60   :  { %v765_v61 = vshll.u32 %v1618_v31, %v762_v13  ;;  %v766_v16 = vshrl.u32 %v1619_v33, %v763_v56  ;;  %v768_v21 = vshll.u32 %v1619_v33, %v762_v13  ;;  %v769_v3 = vshrl.u32 %v1620_v35, %v763_v56 }
  0x61   :  { %v1445_v12 = vmin.u32 %v588_v17, %v1870_v38  ;;  %v761_v24 = vshrl.u32 %v760_v43, 5  ;;  %v771_v26 = vshll.u32 %v1620_v35, %v762_v13  ;;  %v772_v29 = vshrl.u32 %v1621_v37, %v763_v56 }
  0x62   :  { %v774_v30 = vshll.u32 %v1621_v37, %v762_v13  ;;  %v775_v32 = vshrl.u32 %v1622_v39, %v763_v56  ;;  %v777_v36 = vshll.u32 %v1622_v39, %v762_v13  ;;  %v778_v28 = vshrl.u32 %v1623_v47, %v763_v56 }
  0x63   :  { %v590_v22 = vclz %v1445_v12  ;;  %v376_v42 = vand.u32 2147483647, %v375_v11  ;;  %v378_v45 = vcvt.s32.f32 %v371_v54  ;;  %v756_v49 = vor.u32 8388608, %v755_v15 }
  0x64   :  { %v767_v43 = vor.u32 %v766_v16, %v765_v61  ;;  %v770_v50 = vor.u32 %v769_v3, %v768_v21  ;;  %v773_v51 = vor.u32 %v772_v29, %v771_v26  ;;  %v776_v17 = vor.u32 %v775_v32, %v774_v30 }
  0x65   :  { %v1446_v46 = vadd.s32 4294967294, %v590_v22  ;;  %v764_v12 = vshrl.u32 %v1618_v31, %v763_v56  ;;  %vm780_vm10 = vcmp.lt.s32.totalorder %v761_v24, 1  ;;  %vm783_vm11 = vcmp.lt.s32.totalorder %v761_v24, 4 }
  0x66   :  { %v2751_v13 = vstv %s1879_s21  ;;  %v779_v54 = vor.u32 %v778_v28, %v777_v36  ;;  %v785_v11 = vsel %vm783_vm11, %v773_v51, 2102212464  ;;  %v1905_v15 = vmul.f32 %v2753_v55, %v1671_v6 }
  0x67   :  { %vm1447_vm9 = vcmp.lt.s32.totalorder %v1446_v46, 0  ;;  %v154_v56 = vxor.u32 2147483648, %v1876_v59  ;;  %1547 = vpow2.f32 %v512_v60  ;;  %vm782_vm14 = vcmp.lt.s32.totalorder %v761_v24, 3 }
  0x68   :  { %v796_v16 = vshll.u32 %v756_v49, 8  ;;  %v593_v21 = vsel %vm1447_vm9, 0, %v1446_v46  ;;  %vm781_vm15 = vcmp.lt.s32.totalorder %v761_v24, 2  ;;  %v788_v3 = vsel %vm780_vm10, %v767_v43, %v770_v50 }
  0x69   :  { %v789_v22 = vsel %vm783_vm11, %v776_v17, 920167782  ;;  %v1544_v26 = vpop.eup %1543  ;;  %vm1918_vm0 = vcmp.le.f32.partialorder %v296_v14, 0.7853982  ;;  %v379_v10 = vmul.f32 %v378_v45, %v376_v42  ;;  %v578_v30 = vadd.s32 %v1820_v44, %v1825_v48 }
  0x6a   :  { %v784_v60 = vsel %vm780_vm10, %v764_v12, %v767_v43  ;;  %v786_v32 = vsel %vm782_vm14, %v770_v50, %v785_v11  ;;  %v1546_v36 = vpop.eup %1545  ;;  %v790_v28 = vsel %vm782_vm14, %v773_v51, %v789_v22  ;;  %v792_v46 = vsel %vm780_vm10, %v770_v50, %v773_v51 }
  0x6b   :  { %v793_v14 = vsel %vm783_vm11, %v779_v54, 1326507024  ;;  %v977_v42 = vand.u32 2139095040, %v1905_v15  ;;  %v594_v45 = vsub.s32 32, %v593_v21  ;;  %v598_v44 = vsub.s32 4294967266, %v593_v21 }
  0x6c   :  { %v791_v48 = vsel %vm781_vm15, %v788_v3, %v790_v28  ;;  %v794_v49 = vsel %vm782_vm14, %v776_v17, %v793_v14  ;;  %v787_v43 = vsel %vm781_vm15, %v784_v60, %v786_v32  ;;  %v156_v50 = vsub.s32 4, %v1750_v63 }
  0x6d   :  { %v795_v12 = vsel %vm781_vm15, %v792_v46, %v794_v49  ;;  %v1936_v11 = vmul.u32.u64.low %v796_v16, %v791_v48  ;;  %v1937_v22 = vmul.u32.u64.high %v796_v16, %v791_v48, %v1936_v11  ;;  %v380_v51 = vxor.u32 2147483648, %v379_v10 }
  0x6e   :  { %v1941_v54 = vmul.u32.u64.low %v796_v16, %v795_v12  ;;  %v1942_v1 = vmul.u32.u64.high %v796_v16, %v795_v12, %v1941_v54  ;;  %v1946_v58 = vmul.f32 %v1544_v26, %v2750_v52  ;;  %v1951_v17 = vmul.f32 %v2751_v13, %v1671_v6 }
  0x6f   :  { %v978_v3 = vshrl.u32 %v977_v42, 23  ;;  %v155_v60 = vsel %vm72_vm8, %v154_v56, %v1876_v59  ;;  %v382_v32 = vsub.s32 4, %v1779_v41  ;;  %v599_v28 = vadd.s32 127, %v598_v44 }
  0x70   :  { %v803_v46 = vmul.u32 %v796_v16, %v787_v43  ;;  %v595_v14 = vshll.u32 %v1870_v38, %v593_v21  ;;  %v596_v48 = vshrl.u32 %v578_v30, %v594_v45  ;;  %v806_v26 = vadd.s32 1, %v1937_v22 }
  0x71   :  { %v1466_v49 = vadd.s32 4294967169, %v978_v3  ;;  %v1963_v12 = vsel %vm72_vm8, %v156_v50, %v1750_v63  ;;  %v1967_v42 = vmul.f32 %v1546_v36, %v2749_v57  ;;  %v381_v59 = vsel %vm298_vm12, %v380_v51, %v379_v10 }
  0x72   :  { %vm805_vm1 = vc.u32 %v1942_v1, %v1936_v11  ;;  %v158_v38 = vsel %vm1909_vm13, %v1677_v8, %v155_v60  ;;  %v961_v16 = vstv %s1929_s23  ;;  %v1981_v63 = vsel %vm298_vm12, %v382_v32, %v1779_v41 }
  0x73   :  { %v807_v56 = vsel %vm805_vm1, %v806_v26, %v1937_v22  ;;  %v984_v21 = vadd.s32 1, %v1466_v49  ;;  %v600_v30 = vshll.u32 %v599_v28, 23  ;;  %v2756_v10 = vand.u32 2147483647, %v1905_v15 }
  0x74   :  { %v808_v36 = vadd.s32 %v807_v56, %v803_v46  ;;  %v1984_v45 = vpop.eup %1547  ;;  %v159_v44 = vsel %vm1909_vm13, 0, %v1963_v12  ;;  %v384_v43 = vsel %vm1918_vm0, %v1684_v9, %v381_v59  ;;  %v597_v22 = vor.u32 %v596_v48, %v595_v14 }
  0x75   :  { %vm985_vm2 = vcmp.gt.s32.totalorder %v984_v21, 0  ;;  %1549 = vcosq.f32 %v158_v38  ;;  %v1994_v51 = vmul.f32 0.06666667, %v51_v18  ;;  %v385_v54 = vsel %vm1918_vm0, 0, %v1981_v63 }
  0x76   :  { %v809_v50 = vadd.s32 536870912, %v808_v36  ;;  %v986_v41 = vsel %vm985_vm2, %v984_v21, 0  ;;  %1551 = vsinq.f32 %v158_v38  ;;  %v608_v3 = vsub.s32 4, %v1860_v62 }
  0x77   :  { %v988_v60 = vand.u32 31, %v986_v41  ;;  %1553 = vcosq.f32 %v384_v43  ;;  %v601_v32 = vor.u32 4788187, %v600_v30  ;;  %v981_v46 = vand.u32 8388607, %v2756_v10 }
  0x78   :  { %v2000_v28 = vshrl.u32 %v809_v50, 30  ;;  %v604_v14 = vcvt.s32.f32 %v597_v22  ;;  %v2012_v38 = vmul.f32 %v67_v5, %v1994_v51  ;;  %v987_v56 = vshrl.u32 %v986_v41, 5 }
  0x79   :  { %v989_v34 = vsub.s32 32, %v988_v60  ;;  %v991_v18 = vshll.u32 %v1618_v31, %v988_v60  ;;  %v994_v48 = vshll.u32 %v1619_v33, %v988_v60  ;;  %v997_v49 = vshll.u32 %v1620_v35, %v988_v60 }
  0x7a   :  { %v811_v26 = vshll.u32 %v2000_v28, 30  ;;  %v1000_v59 = vshll.u32 %v1621_v37, %v988_v60  ;;  %v602_v50 = vand.u32 2147483647, %v601_v32  ;;  %v982_v52 = vor.u32 8388608, %v981_v46 }
  0x7b   :  { %v992_v21 = vshrl.u32 %v1619_v33, %v989_v34  ;;  %v995_v30 = vshrl.u32 %v1620_v35, %v989_v34  ;;  %v998_v22 = vshrl.u32 %v1621_v37, %v989_v34  ;;  %v1001_v13 = vshrl.u32 %v1622_v39, %v989_v34 }
  0x7c   :  { %v2017_v57 = vsub.s32 %v808_v36, %v811_v26  ;;  %v990_v53 = vshrl.u32 %v1618_v31, %v989_v34  ;;  %v1003_v5 = vshll.u32 %v1622_v39, %v988_v60  ;;  %v1004_v10 = vshrl.u32 %v1623_v47, %v989_v34 }
  0x7d   :  { %v993_v55 = vor.u32 %v992_v21, %v991_v18  ;;  %v996_v20 = vor.u32 %v995_v30, %v994_v48  ;;  %v999_v19 = vor.u32 %v998_v22, %v997_v49  ;;  %v1002_v24 = vor.u32 %v1001_v13, %v1000_v59 }
  0x7e   :  { %v814_v41 = vsub.s32 0, %v2017_v57  ;;  %1555 = vsinq.f32 %v384_v43  ;;  %vm524_vm3 = vcmp.lt.s32.totalorder %v1698_v25, 0  ;;  %vm1006_vm4 = vcmp.lt.s32.totalorder %v987_v56, 1 }
  0x7f   :  { %vm1009_vm5 = vcmp.lt.s32.totalorder %v987_v56, 4  ;;  %v176_v36 = vand.u32 2139095040, %v2012_v38  ;;  %v605_v32 = vmul.f32 %v604_v14, %v602_v50  ;;  %vm1008_vm6 = vcmp.lt.s32.totalorder %v987_v56, 3 }
  0x80   :  { %v1456_v46 = vmin.u32 %v814_v41, %v2017_v57  ;;  %v1022_v18 = vshll.u32 %v982_v52, 8  ;;  %v1005_v48 = vor.u32 %v1004_v10, %v1003_v5  ;;  %vm1007_vm7 = vcmp.lt.s32.totalorder %v987_v56, 2 }
  0x81   :  { %v1011_v60 = vsel %vm1009_vm5, %v999_v19, 2102212464  ;;  %v1014_v26 = vsel %vm1006_vm4, %v993_v55, %v996_v20  ;;  %vm2030_vm8 = vcmp.le.f32.partialorder %v522_v23, 0.7853982  ;;  %v1010_v34 = vsel %vm1006_vm4, %v990_v53, %v993_v55 }
  0x82   :  { %v816_v43 = vclz %v1456_v46  ;;  %v1015_v49 = vsel %vm1009_vm5, %v1002_v24, 920167782  ;;  %v1018_v14 = vsel %vm1006_vm4, %v996_v20, %v999_v19  ;;  %v2035_v59 = vpop.eup %1549  ;;  %v1012_v52 = vsel %vm1008_vm6, %v996_v20, %v1011_v60 }
  0x83   :  { %v1016_v10 = vsel %vm1008_vm6, %v999_v19, %v1015_v49  ;;  %v1019_v21 = vsel %vm1009_vm5, %v1005_v48, 1326507024  ;;  %v177_v30 = vshrl.u32 %v176_v36, 23  ;;  %v2040_v22 = vpop.eup %1551  ;;  %v804_v23 = vadd.s32 %v1936_v11, %v1942_v1 }
  0x84   :  { %v1457_v50 = vadd.s32 4294967294, %v816_v43  ;;  %v1017_v53 = vsel %vm1007_vm7, %v1014_v26, %v1016_v10  ;;  %v1020_v55 = vsel %vm1008_vm6, %v1002_v24, %v1019_v21  ;;  %v2046_v5 = vpop.eup %1553  ;;  %v606_v41 = vxor.u32 2147483648, %v605_v32 }
  0x85   :  { %v1021_v20 = vsel %vm1007_vm7, %v1018_v14, %v1020_v55  ;;  %v2049_v19 = vmul.u32.u64.low %v1022_v18, %v1017_v53  ;;  %v2050_v46 = vmul.u32.u64.high %v1022_v18, %v1017_v53, %v2049_v19  ;;  %v1013_v36 = vsel %vm1007_vm7, %v1010_v34, %v1012_v52 }
  0x86   :  { %vm1458_vm9 = vcmp.lt.s32.totalorder %v1457_v50, 0  ;;  %v2054_v48 = vmul.u32.u64.low %v1022_v18, %v1021_v20  ;;  %v2055_v60 = vmul.u32.u64.high %v1022_v18, %v1021_v20, %v2054_v48  ;;  %v738_v1 = vmul.f32 1.442695, %v1951_v17 }
  0x87   :  { %v819_v11 = vsel %vm1458_vm9, 0, %v1457_v50  ;;  %v962_v24 = vmul.f32 %v961_v16, %v1671_v6  ;;  %v1426_v26 = vadd.s32 4294967169, %v177_v30  ;;  %v2065_v43 = vand.u32 3, %v159_v44 }
  0x88   :  { %v820_v49 = vsub.s32 32, %v819_v11  ;;  %v821_v56 = vshll.u32 %v2017_v57, %v819_v11  ;;  %v824_v34 = vsub.s32 4294967266, %v819_v11  ;;  %v2072_v17 = vand.u32 3, %v385_v54 }
  0x89   :  { %v1029_v14 = vmul.u32 %v1022_v18, %v1013_v36  ;;  %v1032_v6 = vadd.s32 1, %v2050_v46  ;;  %v183_v52 = vadd.s32 1, %v1426_v26  ;;  %v607_v61 = vsel %vm524_vm3, %v606_v41, %v605_v32 }
  0x8a   :  { %v609_v57 = vsel %vm524_vm3, %v608_v3, %v1860_v62  ;;  %v822_v12 = vshrl.u32 %v804_v23, %v820_v49  ;;  %v825_v44 = vadd.s32 127, %v824_v34  ;;  %v2085_v29 = vmul.f32 %v1984_v45, %v516_v0 }
  0x8b   :  { %v964_v63 = vmul.f32 1.442695, %v962_v24  ;;  %vm1031_vm10 = vc.u32 %v2055_v60, %v2049_v19  ;;  %vm184_vm11 = vcmp.gt.s32.totalorder %v183_v52, 0  ;;  %v1556_v54 = vpop.eup %1555  ;;  %vm165_vm12 = vcmp.eq.s32.totalorder %v2065_v43, 0 }
  0x8c   :  { %vm168_vm13 = vcmp.eq.s32.totalorder %v2065_v43, 2  ;;  %v823_v32 = vor.u32 %v822_v12, %v821_v56  ;;  %v826_v18 = vshll.u32 %v825_v44, 23  ;;  %v1033_v62 = vsel %vm1031_vm10, %v1032_v6, %v2050_v46 }
  0x8d   :  { %v610_v3 = vsel %vm2030_vm8, %v1698_v25, %v607_v61  ;;  %v611_v45 = vsel %vm2030_vm8, 0, %v609_v57  ;;  %v1034_v10 = vadd.s32 %v1033_v62, %v1029_v14  ;;  %v185_v21 = vsel %vm184_vm11, %v183_v52, 0 }
  0x8e   :  { %vm391_vm14 = vcmp.eq.s32.totalorder %v2072_v17, 0  ;;  %1557 = vpow2.f32 %v738_v1  ;;  %v827_v30 = vor.u32 4788187, %v826_v18  ;;  %v830_v23 = vcvt.s32.f32 %v823_v32 }
  0x8f   :  { %vm394_vm15 = vcmp.eq.s32.totalorder %v2072_v17, 2  ;;  %1559 = vpow2.f32 %v964_v63  ;;  %v1035_v50 = vadd.s32 536870912, %v1034_v10  ;;  %v187_v53 = vand.u32 31, %v185_v21 }
  0x90   :  { %1561 = vcosq.f32 %v610_v3  ;;  %v2099_v55 = vand.u32 3, %v611_v45  ;;  %vm750_vm0 = vcmp.lt.s32.totalorder %v1817_v40, 0  ;;  %v828_v41 = vand.u32 2147483647, %v827_v30 }
  0x91   :  { %vm164_vm1 = vcmp.lt.s32.totalorder %v2065_v43, 2  ;;  %v166_v13 = vxor.u32 2147483648, %v2040_v22  ;;  %v169_v20 = vxor.u32 2147483648, %v2035_v59  ;;  %v2105_v46 = vshrl.u32 %v1035_v50, 30 }
  0x92   :  { %v2107_v36 = vsub.s32 32, %v187_v53  ;;  %vm390_vm2 = vcmp.lt.s32.totalorder %v2072_v17, 2  ;;  %v392_v48 = vxor.u32 2147483648, %v1556_v54  ;;  %v395_v1 = vxor.u32 2147483648, %v2046_v5 }
  0x93   :  { %1563 = vsinq.f32 %v610_v3  ;;  %vm2113_vm3 = vcmp.le.f32.partialorder %v748_v4, 0.7853982  ;;  %v831_v24 = vmul.f32 %v830_v23, %v828_v41  ;;  %v834_v26 = vsub.s32 4, %v2000_v28 }
  0x94   :  { %v1037_v49 = vshll.u32 %v2105_v46, 30  ;;  %v173_v56 = vand.u32 2147483647, %v2012_v38  ;;  %v199_v34 = vshll.u32 %v1621_v37, %v187_v53  ;;  %v2121_v14 = vshrl.u32 %v185_v21, 5 }
  0x95   :  { %v190_v6 = vshll.u32 %v1618_v31, %v187_v53  ;;  %v200_v52 = vshrl.u32 %v1622_v39, %v2107_v36  ;;  %v202_v4 = vshll.u32 %v1622_v39, %v187_v53  ;;  %v193_v57 = vshll.u32 %v1619_v33, %v187_v53 }
  0x96   :  { %v2127_v61 = vsub.s32 %v1034_v10, %v1037_v49  ;;  %v196_v12 = vshll.u32 %v1620_v35, %v187_v53  ;;  %v203_v44 = vshrl.u32 %v1623_v47, %v2107_v36  ;;  %v832_v63 = vxor.u32 2147483648, %v831_v24 }
  0x97   :  { %v191_v32 = vshrl.u32 %v1619_v33, %v2107_v36  ;;  %v194_v18 = vshrl.u32 %v1620_v35, %v2107_v36  ;;  %v197_v62 = vshrl.u32 %v1621_v37, %v2107_v36  ;;  %v167_v3 = vsel %vm165_vm12, %v2035_v59, %v166_v13 }
  0x98   :  { %v170_v45 = vsel %vm168_vm13, %v169_v20, %v2040_v22  ;;  %v1040_v10 = vsub.s32 0, %v2127_v61  ;;  %v201_v21 = vor.u32 %v200_v52, %v199_v34  ;;  %v396_v30 = vsel %vm394_vm15, %v395_v1, %v1556_v54 }
  0x99   :  { %v180_v23 = vand.u32 8388607, %v173_v56  ;;  %v204_v50 = vor.u32 %v203_v44, %v202_v4  ;;  %vm208_vm4 = vcmp.lt.s32.totalorder %v2121_v14, 4  ;;  %v393_v59 = vsel %vm391_vm14, %v2046_v5, %v392_v48 }
  0x9a   :  { %v2157_v22 = vsel %vm750_vm0, %v834_v26, %v2000_v28  ;;  %v1467_v53 = vmin.u32 %v1040_v10, %v2127_v61  ;;  %v2163_v54 = vmul.f32 %v293_v7, %v1994_v51  ;;  %v833_v41 = vsel %vm750_vm0, %v832_v63, %v831_v24 }
  0x9b   :  { %v2167_v13 = vor.u32 %v191_v32, %v190_v6  ;;  %v2169_v20 = vor.u32 %v194_v18, %v193_v57  ;;  %v198_v1 = vor.u32 %v197_v62, %v196_v12  ;;  %v2171_v5 = vpop.eup %1557  ;;  %vm617_vm5 = vcmp.eq.s32.totalorder %v2099_v55, 0 }
  0x9c   :  { %v1042_v28 = vclz %v1467_v53  ;;  %vm205_vm6 = vcmp.lt.s32.totalorder %v2121_v14, 1  ;;  %vm207_vm7 = vcmp.lt.s32.totalorder %v2121_v14, 3  ;;  %v214_v7 = vsel %vm208_vm4, %v201_v21, 920167782  ;;  %v2178_v48 = vpop.eup %1559 }
  0x9d   :  { %vm162_vm8 = vweird.f32 %v1677_v8  ;;  %v171_v24 = vsel %vm164_vm1, %v167_v3, %v170_v45  ;;  %vm620_vm9 = vcmp.eq.s32.totalorder %v2099_v55, 2  ;;  %v181_v26 = vor.u32 8388608, %v180_v23  ;;  %v1562_v34 = vpop.eup %1561 }
  0x9e   :  { %v218_v49 = vsel %vm208_vm4, %v204_v50, 1326507024  ;;  %vm388_vm10 = vweird.f32 %v1684_v9  ;;  %v397_v6 = vsel %vm390_vm2, %v393_v59, %v396_v30  ;;  %v836_v52 = vsel %vm2113_vm3, %v1817_v40, %v833_v41 }
  0x9f   :  { %v837_v43 = vsel %vm2113_vm3, 0, %v2157_v22  ;;  %v1468_v4 = vadd.s32 4294967294, %v1042_v28  ;;  %vm616_vm11 = vcmp.lt.s32.totalorder %v2099_v55, 2  ;;  %v1030_v57 = vadd.s32 %v2049_v19, %v2055_v60 }
  0xa0   :  { %vm206_vm12 = vcmp.lt.s32.totalorder %v2121_v14, 2  ;;  %v213_v17 = vsel %vm205_vm6, %v2167_v13, %v2169_v20  ;;  %v215_v12 = vsel %vm207_vm7, %v198_v1, %v214_v7  ;;  %v1564_v44 = vpop.eup %1563  ;;  %v217_v11 = vsel %vm205_vm6, %v2169_v20, %v198_v1 }
  0xa1   :  { %vm1469_vm13 = vcmp.lt.s32.totalorder %v1468_v4, 0  ;;  %v219_v63 = vsel %vm207_vm7, %v201_v21, %v218_v49  ;;  %v402_v19 = vand.u32 2139095040, %v2163_v54  ;;  %v621_v60 = vxor.u32 2147483648, %v1562_v34 }
  0xa2   :  { %1565 = vcosq.f32 %v836_v52  ;;  %v1045_v32 = vsel %vm1469_vm13, 0, %v1468_v4  ;;  %v2211_v18 = vshll.u32 %v181_v26, 8  ;;  %vm614_vm14 = vweird.f32 %v1698_v25 }
  0xa3   :  { %vm976_vm15 = vcmp.lt.s32.totalorder %v1905_v15, 0  ;;  %v1046_v62 = vsub.s32 32, %v1045_v32  ;;  %v1047_v3 = vshll.u32 %v2127_v61, %v1045_v32  ;;  %v1050_v45 = vsub.s32 4294967266, %v1045_v32 }
  0xa4   :  { %v216_v10 = vsel %vm206_vm12, %v213_v17, %v215_v12  ;;  %v618_v30 = vxor.u32 2147483648, %v1564_v44  ;;  %1567 = vsinq.f32 %v836_v52  ;;  %v220_v21 = vsel %vm206_vm12, %v217_v11, %v219_v63 }
  0xa5   :  { %v403_v23 = vshrl.u32 %v402_v19, 23  ;;  %v1048_v50 = vshrl.u32 %v1030_v57, %v1046_v62  ;;  %v1051_v59 = vadd.s32 127, %v1050_v45  ;;  %v189_v22 = vshrl.u32 %v1618_v31, %v2107_v36 }
  0xa6   :  { %v210_v53 = vsel %vm208_vm4, %v198_v1, 2102212464  ;;  %v2765_v61 = vand.u32 2147483647, %v1905_v15  ;;  %v2231_v28 = vmul.u32.u64.low %v2211_v18, %v216_v10  ;;  %v2232_v7 = vmul.u32.u64.high %v2211_v18, %v216_v10, %v2231_v28 }
  0xa7   :  { %v399_v26 = vand.u32 2147483647, %v2163_v54  ;;  %v1437_v49 = vadd.s32 4294967169, %v403_v23  ;;  %v1049_v52 = vor.u32 %v1048_v50, %v1047_v3  ;;  %v1052_v4 = vshll.u32 %v1051_v59, 23 }
  0xa8   :  { %vm2226_vm0 = vcmp.le.f32.partialorder %v2765_v61, 0.7853982  ;;  %v2237_v36 = vmul.u32.u64.low %v2211_v18, %v220_v21  ;;  %v2238_v57 = vmul.u32.u64.high %v2211_v18, %v220_v21, %v2237_v36  ;;  %v619_v1 = vsel %vm617_vm5, %v1562_v34, %v618_v30 }
  0xa9   :  { %v622_v17 = vsel %vm620_vm9, %v621_v60, %v1564_v44  ;;  %v1060_v12 = vsub.s32 4, %v2105_v46  ;;  %v409_v11 = vadd.s32 1, %v1437_v49  ;;  %v172_v63 = vsel %vm162_vm8, nan, %v171_v24 }
  0xaa   :  { %v2247_v19 = vand.u32 3, %v837_v43  ;;  %v1053_v32 = vor.u32 4788187, %v1052_v4  ;;  %v1056_v62 = vcvt.s32.f32 %v1049_v52  ;;  %v398_v3 = vsel %vm388_vm10, nan, %v397_v6 }
  0xab   :  { %v209_v34 = vsel %vm205_vm6, %v189_v22, %v2167_v13  ;;  %v211_v44 = vsel %vm207_vm7, %v2169_v20, %v210_v53  ;;  %vm410_vm1 = vcmp.gt.s32.totalorder %v409_v11, 0  ;;  %v623_v8 = vsel %vm616_vm11, %v619_v1, %v622_v17 }
  0xac   :  { %v1054_v24 = vand.u32 2147483647, %v1053_v32  ;;  %v406_v43 = vand.u32 8388607, %v399_v26  ;;  %v411_v60 = vsel %vm410_vm1, %v409_v11, 0  ;;  %v2262_v9 = vmul.f32 %v172_v63, %v1946_v58 }
  0xad   :  { %v2768_v6 = vstv %s1898_s22  ;;  %v2272_v13 = vsel %vm976_vm15, %v1060_v12, %v2105_v46  ;;  %v413_v20 = vand.u32 31, %v411_v60  ;;  %v502_v55 = vmul.f32 %v398_v3, %v1967_v42 }
  0xae   :  { %v2267_v45 = vmul.f32 %v2171_v5, %v2768_v6  ;;  %vm843_vm2 = vcmp.eq.s32.totalorder %v2247_v19, 0  ;;  %v1057_v10 = vmul.f32 %v1056_v62, %v1054_v24  ;;  %v212_v30 = vsel %vm206_vm12, %v209_v34, %v211_v44 }
  0xaf   :  { %v624_v58 = vsel %vm614_vm14, nan, %v623_v8  ;;  %vm846_vm3 = vcmp.eq.s32.totalorder %v2247_v19, 2  ;;  %v231_v5 = vadd.s32 1, %v2232_v7  ;;  %v414_v21 = vsub.s32 32, %v413_v20  ;;  %v1566_v46 = vpop.eup %1565 }
  0xb0   :  { %v1058_v23 = vxor.u32 2147483648, %v1057_v10  ;;  %v1063_v42 = vsel %vm2226_vm0, 0, %v2272_v13  ;;  %vm230_vm4 = vc.u32 %v2238_v57, %v2231_v28  ;;  %v407_v14 = vor.u32 8388608, %v406_v43 }
  0xb1   :  { %vm842_vm5 = vcmp.lt.s32.totalorder %v2247_v19, 2  ;;  %v228_v25 = vmul.u32 %v2211_v18, %v212_v30  ;;  %v416_v50 = vshll.u32 %v1618_v31, %v413_v20  ;;  %v417_v59 = vshrl.u32 %v1619_v33, %v414_v21  ;;  %v1568_v53 = vpop.eup %1567 }
  0xb2   :  { %v419_v22 = vshll.u32 %v1619_v33, %v413_v20  ;;  %v1059_v61 = vsel %vm976_vm15, %v1058_v23, %v1057_v10  ;;  %v420_v49 = vshrl.u32 %v1620_v35, %v414_v21  ;;  %v422_v52 = vshll.u32 %v1620_v35, %v413_v20 }
  0xb3   :  { %v2769_v4 = vstv %s1679_s12  ;;  %v1062_v18 = vsel %vm2226_vm0, %v1905_v15, %v1059_v61  ;;  %v232_v1 = vsel %vm230_vm4, %v231_v5, %v2232_v7  ;;  %v412_v17 = vshrl.u32 %v411_v60, 5  ;;  %s1641_s12 = smov 89  }
  0xb4   :  { %v2299_v36 = vmul.f32 %v2769_v4, %v1994_v51  ;;  %v423_v12 = vshrl.u32 %v1621_v37, %v414_v21  ;;  %vm840_vm6 = vweird.f32 %v1817_v40  ;;  %v847_v11 = vxor.u32 2147483648, %v1566_v46 }
  0xb5   :  { %1569 = vcosq.f32 %v1062_v18  ;;  %v425_v63 = vshll.u32 %v1621_v37, %v413_v20  ;;  %v2308_v32 = vshll.u32 %v407_v14, 8  ;;  %v844_v62 = vxor.u32 2147483648, %v1568_v53 }
  0xb6   :  { %1571 = vsinq.f32 %v1062_v18  ;;  %v418_v3 = vor.u32 %v417_v59, %v416_v50  ;;  %v421_v34 = vor.u32 %v420_v49, %v419_v22  ;;  %v424_v44 = vor.u32 %v423_v12, %v422_v52 }
  0xb7   :  { %v426_v41 = vshrl.u32 %v1622_v39, %v414_v21  ;;  %v428_v7 = vshll.u32 %v1622_v39, %v413_v20  ;;  %v429_v8 = vshrl.u32 %v1623_v47, %v414_v21  ;;  %v2313_v24 = vadd.s32 %v232_v1, %v228_v25 }
  0xb8   :  { %v415_v43 = vshrl.u32 %v1618_v31, %v414_v21  ;;  %vm431_vm7 = vcmp.lt.s32.totalorder %v412_v17, 1  ;;  %vm434_vm8 = vcmp.lt.s32.totalorder %v412_v17, 4  ;;  %v848_v60 = vsel %vm846_vm3, %v847_v11, %v1568_v53 }
  0xb9   :  { %v427_v6 = vor.u32 %v426_v41, %v425_v63  ;;  %v430_v13 = vor.u32 %v429_v8, %v428_v7  ;;  %vm433_vm9 = vcmp.lt.s32.totalorder %v412_v17, 3  ;;  %v845_v10 = vsel %vm843_vm2, %v1566_v46, %v844_v62 }
  0xba   :  { %vm432_vm10 = vcmp.lt.s32.totalorder %v412_v17, 2  ;;  %v436_v20 = vsel %vm434_vm8, %v424_v44, 2102212464  ;;  %v439_v30 = vsel %vm431_vm7, %v418_v3, %v421_v34  ;;  %v443_v23 = vsel %vm431_vm7, %v421_v34, %v424_v44 }
  0xbb   :  { %v440_v5 = vsel %vm434_vm8, %v427_v6, 920167782  ;;  %v444_v14 = vsel %vm434_vm8, %v430_v13, 1326507024  ;;  %v628_v21 = vand.u32 2139095040, %v2299_v36  ;;  %v435_v25 = vsel %vm431_vm7, %v415_v43, %v418_v3 }
  0xbc   :  { %v437_v50 = vsel %vm433_vm9, %v421_v34, %v436_v20  ;;  %v441_v59 = vsel %vm433_vm9, %v424_v44, %v440_v5  ;;  %v445_v22 = vsel %vm433_vm9, %v427_v6, %v444_v14  ;;  %v504_v53 = vadd.f32 %v502_v55, %v2262_v9 }
  0xbd   :  { %v728_v61 = vmul.f32 %v624_v58, %v2085_v29  ;;  %v849_v46 = vsel %vm842_vm5, %v845_v10, %v848_v60  ;;  %v442_v49 = vsel %vm432_vm10, %v439_v30, %v441_v59  ;;  %v1067_v52 = vand.u32 3, %v1063_v42 }
  0xbe   :  { %v446_v4 = vsel %vm432_vm10, %v443_v23, %v445_v22  ;;  %v2330_v18 = vmul.u32.u64.low %v2308_v32, %v442_v49  ;;  %v2331_v1 = vmul.u32.u64.high %v2308_v32, %v442_v49, %v2330_v18  ;;  %v234_v12 = vadd.s32 536870912, %v2313_v24 }
  0xbf   :  { %v438_v11 = vsel %vm432_vm10, %v435_v25, %v437_v50  ;;  %v2337_v9 = vmul.u32.u64.low %v2308_v32, %v446_v4  ;;  %v2338_v29 = vmul.u32.u64.high %v2308_v32, %v446_v4, %v2337_v9  ;;  %v850_v19 = vsel %vm840_vm6, nan, %v849_v46 }
  0xc0   :  { %v629_v55 = vshrl.u32 %v628_v21, 23  ;;  %v730_v58 = vadd.f32 %v728_v61, %v504_v53  ;;  %v968_v42 = vstv %s2318_s24  ;;  %vm1072_vm11 = vcmp.eq.s32.totalorder %v1067_v52, 2 }
  0xc1   :  { %v454_v62 = vmul.u32 %v2308_v32, %v438_v11  ;;  %v457_v3 = vadd.s32 1, %v2331_v1  ;;  %v954_v44 = vmul.f32 %v850_v19, %v2267_v45  ;;  %vm1069_vm12 = vcmp.eq.s32.totalorder %v1067_v52, 0 }
  0xc2   :  { %v1570_v63 = vpop.eup %1569  ;;  %v1448_v34 = vadd.s32 4294967169, %v629_v55  ;;  %v2346_v7 = vshrl.u32 %v234_v12, 30  ;;  %vm1068_vm13 = vcmp.lt.s32.totalorder %v1067_v52, 2  ;;  %vm456_vm14 = vc.u32 %v2338_v29, %v2330_v18 }
  0xc3   :  { %v1572_v17 = vpop.eup %1571  ;;  %v1073_v41 = vxor.u32 2147483648, %v1570_v63  ;;  %v969_v43 = vmul.f32 %v2178_v48, %v968_v42  ;;  %vm1066_vm15 = vweird.f32 %v1905_v15  ;;  %v458_v60 = vsel %vm456_vm14, %v457_v3, %v2331_v1 }
  0xc4   :  { %v1070_v40 = vxor.u32 2147483648, %v1572_v17  ;;  %v635_v8 = vadd.s32 1, %v1448_v34  ;;  %v2355_v45 = vadd.s32 %v458_v60, %v454_v62  ;;  %v625_v13 = vand.u32 2147483647, %v2299_v36 }
  0xc5   :  { %v1074_v32 = vsel %vm1072_vm11, %v1073_v41, %v1572_v17  ;;  %v956_v10 = vadd.f32 %v954_v44, %v730_v58  ;;  %v236_v30 = vshll.u32 %v2346_v7, 30  ;;  %vm38_vm1 = vcmp.lt.s32.totalorder %v1664_v2, 16 }
  0xc6   :  { %v1071_v6 = vsel %vm1069_vm12, %v1570_v63, %v1070_v40  ;;  %vm636_vm0 = vcmp.gt.s32.totalorder %v635_v8, 0  ;;  %v460_v15 = vadd.s32 536870912, %v2355_v45  ;;  %v632_v48 = vand.u32 8388607, %v625_v13 }
  0xc7   :  { %v1075_v20 = vsel %vm1068_vm13, %v1071_v6, %v1074_v32  ;;  %v637_v5 = vsel %vm636_vm0, %v635_v8, 0  ;;  %v2364_v59 = vsub.s32 %v2313_v24, %v236_v30  ;;  %v2770_v11 = vstv %s1777_s13  ;;  %s1642_s13 = smov 97  }
  0xc8   :  { %v1076_v23 = vsel %vm1066_vm15, nan, %v1075_v20  ;;  %v639_v14 = vand.u32 31, %v637_v5  ;;  %v638_v22 = vshrl.u32 %v637_v5, 5  ;;  %v2378_v24 = vshrl.u32 %v460_v15, 30 }
  0xc9   :  { %v1180_v21 = vmul.f32 %v1076_v23, %v969_v43  ;;  %v633_v1 = vor.u32 8388608, %v632_v48  ;;  %v2384_v9 = vmul.f32 %v2770_v11, %v1994_v51  ;;  %v239_v44 = vsub.s32 0, %v2364_v59 }
  0xca   :  { %v640_v25 = vsub.s32 32, %v639_v14  ;;  %v642_v53 = vshll.u32 %v1618_v31, %v639_v14  ;;  %v645_v61 = vshll.u32 %v1619_v33, %v639_v14  ;;  %v648_v46 = vshll.u32 %v1620_v35, %v639_v14 }
  0xcb   :  { %v1182_v50 = vadd.f32 %v1180_v21, %v956_v10  ;;  %v651_v4 = vshll.u32 %v1621_v37, %v639_v14  ;;  %v654_v62 = vshll.u32 %v1622_v39, %v639_v14  ;;  %vm657_vm2 = vcmp.lt.s32.totalorder %v638_v22, 1 }
  0xcc   :  { %v643_v2 = vshrl.u32 %v1619_v33, %v640_v25  ;;  %v646_v52 = vshrl.u32 %v1620_v35, %v640_v25  ;;  %v649_v12 = vshrl.u32 %v1621_v37, %v640_v25  ;;  %v652_v19 = vshrl.u32 %v1622_v39, %v640_v25 }
  0xcd   :  { %v2369_v49 = vsel %vm38_vm1, %v1182_v50, 0.0  ;;  %v641_v55 = vshrl.u32 %v1618_v31, %v640_v25  ;;  %v655_v17 = vshrl.u32 %v1623_v47, %v640_v25  ;;  %v462_v41 = vshll.u32 %v2378_v24, 30 }
  0xce   :  { %1196 = vrot.lane.b32.xlu1 %v2369_v49, %s1624_s25  ;;  %1188 = vrot.lane.b32.xlu0 %v2369_v49, %s1625_s26  ;;  %v644_v58 = vor.u32 %v643_v2, %v642_v53  ;;  %v647_v63 = vor.u32 %v646_v52, %v645_v61  ;;  %v650_v3 = vor.u32 %v649_v12, %v648_v46  ;;  %v673_v40 = vshll.u32 %v633_v1, 8 }
  0xcf   :  { %v653_v34 = vor.u32 %v652_v19, %v651_v4  ;;  %v854_v8 = vand.u32 2139095040, %v2384_v9  ;;  %v656_v43 = vor.u32 %v655_v17, %v654_v62  ;;  %vm658_vm3 = vcmp.lt.s32.totalorder %v638_v22, 2 }
  0xd0   :  { %vm659_vm4 = vcmp.lt.s32.totalorder %v638_v22, 3  ;;  %vm660_vm5 = vcmp.lt.s32.totalorder %v638_v22, 4  ;;  %v661_v32 = vsel %vm657_vm2, %v641_v55, %v644_v58  ;;  %v665_v6 = vsel %vm657_vm2, %v644_v58, %v647_v63 }
  0xd1   :  { %v662_v60 = vsel %vm660_vm5, %v650_v3, 2102212464  ;;  %v666_v10 = vsel %vm660_vm5, %v653_v34, 920167782  ;;  %v669_v5 = vsel %vm657_vm2, %v647_v63, %v650_v3  ;;  %v670_v23 = vsel %vm660_vm5, %v656_v43, 1326507024 }
  0xd2   :  { %1204 = vrot.lane.b32.xlu0 %v2369_v49, %s1626_s27  ;;  %v663_v20 = vsel %vm659_vm4, %v647_v63, %v662_v60  ;;  %v667_v30 = vsel %vm659_vm4, %v650_v3, %v666_v10  ;;  %v671_v21 = vsel %vm659_vm4, %v653_v34, %v670_v23  ;;  %v2402_v15 = vsub.s32 %v2355_v45, %v462_v41 }
  0xd3   :  { %v668_v14 = vsel %vm658_vm3, %v665_v6, %v667_v30  ;;  %v672_v48 = vsel %vm658_vm3, %v669_v5, %v671_v21  ;;  %v1427_v53 = vmin.u32 %v239_v44, %v2364_v59  ;;  %v664_v61 = vsel %vm658_vm3, %v661_v32, %v663_v20 }
  0xd4   :  { %v2405_v25 = vmul.u32.u64.low %v673_v40, %v668_v14  ;;  %v2406_v50 = vmul.u32.u64.high %v673_v40, %v668_v14, %v2405_v25  ;;  %v2411_v46 = vmul.u32.u64.low %v673_v40, %v672_v48  ;;  %v2412_v2 = vmul.u32.u64.high %v673_v40, %v672_v48, %v2411_v46 }
  0xd5   :  { %v855_v52 = vshrl.u32 %v854_v8, 23  ;;  %v465_v45 = vsub.s32 0, %v2402_v15  ;;  %v680_v4 = vmul.u32 %v673_v40, %v664_v61  ;;  %v241_v11 = vclz %v1427_v53 }
  0xd6   :  { %1212 = vrot.lane.b32.xlu0 %v2369_v49, %s1627_s28  ;;  %v683_v1 = vadd.s32 1, %v2406_v50  ;;  %vm682_vm6 = vc.u32 %v2412_v2, %v2405_v25  ;;  %v851_v63 = vand.u32 2147483647, %v2384_v9 }
  0xd7   :  { %v1459_v12 = vadd.s32 4294967169, %v855_v52  ;;  %v1438_v55 = vmin.u32 %v465_v45, %v2402_v15  ;;  %v1428_v62 = vadd.s32 4294967294, %v241_v11 }
  0xd8   :  { %v684_v19 = vsel %vm682_vm6, %v683_v1, %v2406_v50  ;;  %v858_v40 = vand.u32 8388607, %v851_v63 }
  0xd9   :  { %v861_v22 = vadd.s32 1, %v1459_v12  ;;  %v685_v58 = vadd.s32 %v684_v19, %v680_v4  ;;  %v467_v44 = vclz %v1438_v55  ;;  %vm1429_vm8 = vcmp.lt.s32.totalorder %v1428_v62, 0 }
  0xda   :  { %1220 = vrot.lane.b32.xlu0 %v2369_v49, %s1628_s29  ;;  %v859_v53 = vor.u32 8388608, %v858_v40  ;;  %v244_v46 = vsel %vm1429_vm8, 0, %v1428_v62  ;;  %v2771_v62 = vstv %s1856_s20  ;;  %vm401_vm8 = vcmp.lt.s32.totalorder %v2163_v54, 0 }
  0xdb   :  { %vm862_vm7 = vcmp.gt.s32.totalorder %v861_v22, 0  ;;  %v686_v34 = vadd.s32 536870912, %v685_v58  ;;  %v1439_v48 = vadd.s32 4294967294, %v467_v44  ;;  %v249_v19 = vsub.s32 4294967266, %v244_v46 }
  0xdc   :  { %v863_v3 = vsel %vm862_vm7, %v861_v22, 0  ;;  %vm175_vm7 = vcmp.lt.s32.totalorder %v2012_v38, 0 }
  0xdd   :  { %v865_v17 = vand.u32 31, %v863_v3  ;;  %v2425_v41 = vshrl.u32 %v686_v34, 30  ;;  %v864_v43 = vshrl.u32 %v863_v3, 5  ;;  %vm1440_vm10 = vcmp.lt.s32.totalorder %v1439_v48, 0 }
  0xde   :  { %1228 = vrot.lane.b32.xlu0 %v2369_v49, %s1629_s30  ;;  %v2449_v3 = vmul.f32 %v2771_v62, %v1994_v51 }
  0xdf   :  { %v866_v8 = vsub.s32 32, %v865_v17  ;;  %v868_v32 = vshll.u32 %v1618_v31, %v865_v17  ;;  %v871_v60 = vshll.u32 %v1619_v33, %v865_v17  ;;  %v688_v6 = vshll.u32 %v2425_v41, 30 }
  0xe0   :  { %v874_v20 = vshll.u32 %v1620_v35, %v865_v17  ;;  %v877_v30 = vshll.u32 %v1621_v37, %v865_v17  ;;  %v880_v21 = vshll.u32 %v1622_v39, %v865_v17  ;;  %vm883_vm9 = vcmp.lt.s32.totalorder %v864_v43, 1 }
  0xe1   :  { %v869_v10 = vshrl.u32 %v1619_v33, %v866_v8  ;;  %v872_v5 = vshrl.u32 %v1620_v35, %v866_v8  ;;  %v875_v23 = vshrl.u32 %v1621_v37, %v866_v8  ;;  %v878_v14 = vshrl.u32 %v1622_v39, %v866_v8 }
  0xe2   :  { %v2439_v50 = vsub.s32 %v685_v58, %v688_v6  ;;  %v881_v61 = vshrl.u32 %v1623_v47, %v866_v8  ;;  %v867_v52 = vshrl.u32 %v1618_v31, %v866_v8  ;;  %v899_v58 = vshll.u32 %v859_v53, 8 }
  0xe3   :  { %v870_v4 = vor.u32 %v869_v10, %v868_v32  ;;  %v873_v1 = vor.u32 %v872_v5, %v871_v60  ;;  %v879_v12 = vor.u32 %v878_v14, %v877_v30  ;;  %v876_v11 = vor.u32 %v875_v23, %v874_v20 }
  0xe4   :  { %v691_v45 = vsub.s32 0, %v2439_v50  ;;  %v882_v22 = vor.u32 %v881_v61, %v880_v21  ;;  %vm884_vm11 = vcmp.lt.s32.totalorder %v864_v43, 2  ;;  %vm885_vm12 = vcmp.lt.s32.totalorder %v864_v43, 3 }
  0xe5   :  { %vm886_vm13 = vcmp.lt.s32.totalorder %v864_v43, 4  ;;  %v887_v34 = vsel %vm883_vm9, %v867_v52, %v870_v4  ;;  %v891_v44 = vsel %vm883_vm9, %v870_v4, %v873_v1  ;;  %v895_v60 = vsel %vm883_vm9, %v873_v1, %v876_v11 }
  0xe6   :  { %v1449_v55 = vmin.u32 %v691_v45, %v2439_v50  ;;  %v888_v17 = vsel %vm886_vm13, %v876_v11, 2102212464  ;;  %v892_v40 = vsel %vm886_vm13, %v879_v12, 920167782  ;;  %v896_v6 = vsel %vm886_vm13, %v882_v22, 1326507024 }
  0xe7   :  { %v889_v8 = vsel %vm885_vm12, %v873_v1, %v888_v17  ;;  %v893_v32 = vsel %vm885_vm12, %v876_v11, %v892_v40  ;;  %v470_v10 = vsel %vm1440_vm10, 0, %v1439_v48  ;;  %v897_v5 = vsel %vm885_vm12, %v879_v12, %v896_v6 }
  0xe8   :  { %v693_v20 = vclz %v1449_v55  ;;  %v894_v30 = vsel %vm884_vm11, %v891_v44, %v893_v32  ;;  %v890_v23 = vsel %vm884_vm11, %v887_v34, %v889_v8  ;;  %v898_v14 = vsel %vm884_vm11, %v895_v60, %v897_v5 }
  0xe9   :  { %v2454_v21 = vmul.u32.u64.low %v899_v58, %v894_v30  ;;  %v2455_v53 = vmul.u32.u64.high %v899_v58, %v894_v30, %v2454_v21  ;;  %v229_v61 = vadd.s32 %v2231_v28, %v2238_v57  ;;  %v245_v52 = vsub.s32 32, %v244_v46 }
  0xea   :  { %v2459_v45 = vmul.u32.u64.low %v899_v58, %v898_v14  ;;  %v2460_v4 = vmul.u32.u64.high %v899_v58, %v898_v14, %v2459_v45  ;;  %v250_v1 = vadd.s32 127, %v249_v19  ;;  %v1080_v48 = vand.u32 2139095040, %v2449_v3 }
  0xeb   :  { %v475_v11 = vsub.s32 4294967266, %v470_v10  ;;  %v906_v22 = vmul.u32 %v899_v58, %v890_v23  ;;  %v246_v12 = vshll.u32 %v2364_v59, %v244_v46  ;;  %v1450_v55 = vadd.s32 4294967294, %v693_v20 }
  0xec   :  { %v909_v43 = vadd.s32 1, %v2455_v53  ;;  %v1081_v62 = vshrl.u32 %v1080_v48, 23  ;;  %v247_v34 = vshrl.u32 %v229_v61, %v245_v52  ;;  %v455_v17 = vadd.s32 %v2330_v18, %v2338_v29 }
  0xed   :  { %v471_v28 = vsub.s32 32, %v470_v10  ;;  %vm908_vm14 = vc.u32 %v2460_v4, %v2454_v21  ;;  %v251_v57 = vshll.u32 %v250_v1, 23  ;;  %v476_v40 = vadd.s32 127, %v475_v11 }
  0xee   :  { %v910_v19 = vsel %vm908_vm14, %v909_v43, %v2455_v53  ;;  %v1470_v44 = vadd.s32 4294967169, %v1081_v62  ;;  %vm1451_vm15 = vcmp.lt.s32.totalorder %v1450_v55, 0  ;;  %v2469_v59 = vor.u32 %v247_v34, %v246_v12 }
  0xef   :  { %v911_v8 = vadd.s32 %v910_v19, %v906_v22  ;;  %v472_v46 = vshll.u32 %v2402_v15, %v470_v10  ;;  %v473_v32 = vshrl.u32 %v455_v17, %v471_v28  ;;  %v2472_v6 = vor.u32 4788187, %v251_v57 }
  0xf0   :  { %v1087_v58 = vadd.s32 1, %v1470_v44  ;;  %v1077_v18 = vand.u32 2147483647, %v2449_v3  ;;  %v477_v29 = vshll.u32 %v476_v40, 23  ;;  %v2475_v20 = vsel %vm1451_vm15, 0, %v1450_v55 }
  0xf1   :  { %v912_v60 = vadd.s32 536870912, %v911_v8  ;;  %v255_v14 = vcvt.s32.f32 %v2469_v59  ;;  %v2480_v53 = vor.u32 %v473_v32, %v472_v46  ;;  %v253_v10 = vand.u32 2147483647, %v2472_v6 }
  0xf2   :  { %vm1088_vm0 = vcmp.gt.s32.totalorder %v1087_v58, 0  ;;  %v701_v61 = vsub.s32 4294967266, %v2475_v20  ;;  %v1084_v52 = vand.u32 8388607, %v1077_v18  ;;  %v2487_v1 = vor.u32 4788187, %v477_v29 }
  0xf3   :  { %v2477_v30 = vshrl.u32 %v912_v60, 30  ;;  %v1089_v5 = vsel %vm1088_vm0, %v1087_v58, 0  ;;  %v681_v48 = vadd.s32 %v2405_v25, %v2412_v2  ;;  %v697_v11 = vsub.s32 32, %v2475_v20 }
  0xf4   :  { %v1091_v23 = vand.u32 31, %v1089_v5  ;;  %v481_v34 = vcvt.s32.f32 %v2480_v53  ;;  %v698_v17 = vshll.u32 %v2439_v50, %v2475_v20  ;;  %v702_v2 = vadd.s32 127, %v701_v61 }
  0xf5   :  { %v914_v15 = vshll.u32 %v2477_v30, 30  ;;  %v1085_v57 = vor.u32 8388608, %v1084_v52  ;;  %v1090_v19 = vshrl.u32 %v1089_v5, 5  ;;  %v699_v40 = vshrl.u32 %v681_v48, %v697_v11 }
  0xf6   :  { %v1092_v45 = vsub.s32 32, %v1091_v23  ;;  %v1094_v12 = vshll.u32 %v1618_v31, %v1091_v23  ;;  %v1097_v43 = vshll.u32 %v1619_v33, %v1091_v23  ;;  %v1100_v62 = vshll.u32 %v1620_v35, %v1091_v23 }
  0xf7   :  { %v2492_v22 = vsub.s32 %v911_v8, %v914_v15  ;;  %v907_v8 = vadd.s32 %v2454_v21, %v2460_v4  ;;  %v1103_v58 = vshll.u32 %v1621_v37, %v1091_v23  ;;  %v1106_v20 = vshll.u32 %v1622_v39, %v1091_v23 }
  0xf8   :  { %v1095_v55 = vshrl.u32 %v1619_v33, %v1092_v45  ;;  %v1098_v25 = vshrl.u32 %v1620_v35, %v1092_v45  ;;  %v1101_v44 = vshrl.u32 %v1621_v37, %v1092_v45  ;;  %v1093_v46 = vshrl.u32 %v1618_v31, %v1092_v45 }
  0xf9   :  { %v917_v28 = vsub.s32 0, %v2492_v22  ;;  %v1104_v35 = vshrl.u32 %v1622_v39, %v1092_v45  ;;  %v1107_v5 = vshrl.u32 %v1623_v47, %v1092_v45  ;;  %v703_v53 = vshll.u32 %v702_v2, 23 }
  0xfa   :  { %v1096_v32 = vor.u32 %v1095_v55, %v1094_v12  ;;  %v1099_v50 = vor.u32 %v1098_v25, %v1097_v43  ;;  %v1102_v60 = vor.u32 %v1101_v44, %v1100_v62  ;;  %vm1109_vm1 = vcmp.lt.s32.totalorder %v1090_v19, 1 }
  0xfb   :  { %v1460_v33 = vmin.u32 %v917_v28, %v2492_v22  ;;  %vm1112_vm2 = vcmp.lt.s32.totalorder %v1090_v19, 4  ;;  %v1125_v21 = vshll.u32 %v1085_v57, 8  ;;  %v1105_v15 = vor.u32 %v1104_v35, %v1103_v58 }
  0xfc   :  { %v1108_v61 = vor.u32 %v1107_v5, %v1106_v20  ;;  %vm1111_vm3 = vcmp.lt.s32.totalorder %v1090_v19, 3  ;;  %vm1110_vm4 = vcmp.lt.s32.totalorder %v1090_v19, 2  ;;  %v1113_v31 = vsel %vm1109_vm1, %v1093_v46, %v1096_v32 }
  0xfd   :  { %v919_v29 = vclz %v1460_v33  ;;  %v1114_v37 = vsel %vm1112_vm2, %v1102_v60, 2102212464  ;;  %v1117_v52 = vsel %vm1109_vm1, %v1096_v32, %v1099_v50  ;;  %v1118_v48 = vsel %vm1112_vm2, %v1105_v15, 920167782 }
  0xfe   :  { %v1121_v11 = vsel %vm1109_vm1, %v1099_v50, %v1102_v60  ;;  %v1122_v12 = vsel %vm1112_vm2, %v1108_v61, 1326507024  ;;  %v1115_v39 = vsel %vm1111_vm3, %v1099_v50, %v1114_v37  ;;  %v1119_v23 = vsel %vm1111_vm3, %v1102_v60, %v1118_v48 }
  0xff   :  { %v1461_v4 = vadd.s32 4294967294, %v919_v29  ;;  %v1123_v47 = vsel %vm1111_vm3, %v1105_v15, %v1122_v12  ;;  %v479_v45 = vand.u32 2147483647, %v2487_v1  ;;  %v1120_v28 = vsel %vm1110_vm4, %v1117_v52, %v1119_v23 }
 0x100   :  { %v700_v25 = vor.u32 %v699_v40, %v698_v17  ;;  %v1124_v2 = vsel %vm1110_vm4, %v1121_v11, %v1123_v47  ;;  %v2514_v57 = vmul.u32.u64.low %v1125_v21, %v1120_v28  ;;  %v2515_v44 = vmul.u32.u64.high %v1125_v21, %v1120_v28, %v2514_v57 }
 0x101   :  { %vm1462_vm5 = vcmp.lt.s32.totalorder %v1461_v4, 0  ;;  %v1116_v58 = vsel %vm1110_vm4, %v1113_v31, %v1115_v39  ;;  %v2519_v46 = vmul.u32.u64.low %v1125_v21, %v1124_v2  ;;  %v2520_v32 = vmul.u32.u64.high %v1125_v21, %v1124_v2, %v2519_v46 }
 0x102   :  { %v922_v55 = vsel %vm1462_vm5, 0, %v1461_v4  ;;  %v704_v50 = vor.u32 4788187, %v703_v53  ;;  %v256_v17 = vmul.f32 %v255_v14, %v253_v10  ;;  %v1132_v40 = vmul.u32 %v1125_v21, %v1116_v58 }
 0x103   :  { %v923_v43 = vsub.s32 32, %v922_v55  ;;  %v927_v62 = vsub.s32 4294967266, %v922_v55  ;;  %v924_v1 = vshll.u32 %v2492_v22, %v922_v55  ;;  %v1135_v35 = vadd.s32 1, %v2515_v44 }
 0x104   :  { %v482_v20 = vmul.f32 %v481_v34, %v479_v45  ;;  %v707_v5 = vcvt.s32.f32 %v700_v25  ;;  %v705_v19 = vand.u32 2147483647, %v704_v50  ;;  %vm1134_vm6 = vc.u32 %v2520_v32, %v2514_v57 }
 0x105   :  { %v928_v33 = vadd.s32 127, %v927_v62  ;;  %v925_v60 = vshrl.u32 %v907_v8, %v923_v43  ;;  %v1136_v22 = vsel %vm1134_vm6, %v1135_v35, %v2515_v44  ;;  %v257_v8 = vxor.u32 2147483648, %v256_v17 }
 0x106   :  { %v1137_v53 = vadd.s32 %v1136_v22, %v1132_v40  ;;  %v483_v6 = vxor.u32 2147483648, %v482_v20  ;;  %v708_v59 = vmul.f32 %v707_v5, %v705_v19  ;;  %vm2535_vm9 = vcmp.le.f32.partialorder %v173_v56, 0.7853982 }
 0x107   :  { %v929_v29 = vshll.u32 %v928_v33, 23  ;;  %v926_v4 = vor.u32 %v925_v60, %v924_v1  ;;  %v258_v61 = vsel %vm175_vm7, %v257_v8, %v256_v17  ;;  %vm2545_vm10 = vcmp.le.f32.partialorder %v399_v26, 0.7853982 }
 0x108   :  { %v1138_v21 = vadd.s32 536870912, %v1137_v53  ;;  %v484_v52 = vsel %vm401_vm8, %v483_v6, %v482_v20  ;;  %v709_v48 = vxor.u32 2147483648, %v708_v59  ;;  %v261_v12 = vsel %vm2535_vm9, %v2012_v38, %v258_v61 }
 0x109   :  { %v930_v15 = vor.u32 4788187, %v929_v29  ;;  %v933_v10 = vcvt.s32.f32 %v926_v4  ;;  %vm627_vm11 = vcmp.lt.s32.totalorder %v2299_v36, 0  ;;  %v2776_v39 = vstv %s1797_s14  ;;  %s1643_s14 = smov 105  }
 0x10a   :  { %v2541_v31 = vshrl.u32 %v1138_v21, 30  ;;  %v59_v26 = vmul.f32 %v2776_v39, %v1994_v51  ;;  %v487_v23 = vsel %vm2545_vm10, %v2163_v54, %v484_v52  ;;  %vm2564_vm12 = vcmp.le.f32.partialorder %v625_v13, 0.7853982 }
 0x10b   :  { %v931_v14 = vand.u32 2147483647, %v930_v15  ;;  %1573 = vcosq.f32 %v261_v12  ;;  %v710_v45 = vsel %vm627_vm11, %v709_v48, %v708_v59  ;;  %vm853_vm13 = vcmp.lt.s32.totalorder %v2384_v9, 0 }
 0x10c   :  { %v1140_v56 = vshll.u32 %v2541_v31, 30  ;;  %1575 = vsinq.f32 %v261_v12  ;;  %v259_v28 = vsub.s32 4, %v2346_v7  ;;  %v62_v2 = vmul.f32 1.442695, %v59_v26 }
 0x10d   :  { %v934_v11 = vmul.f32 %v933_v10, %v931_v14  ;;  %1577 = vcosq.f32 %v487_v23  ;;  %v713_v13 = vsel %vm2564_vm12, %v2299_v36, %v710_v45  ;;  %v2779_v44 = vstv %s1803_s15  ;;  %s1644_s15 = smov 113  }
 0x10e   :  { %v1141_v55 = vsub.s32 %v1137_v53, %v1140_v56  ;;  %1579 = vsinq.f32 %v487_v23  ;;  %v285_v33 = vmul.f32 %v2779_v44, %v1994_v51  ;;  %vm2580_vm14 = vcmp.le.f32.partialorder %v851_v63, 0.7853982 }
 0x10f   :  { %v935_v43 = vxor.u32 2147483648, %v934_v11  ;;  %v485_v1 = vsub.s32 4, %v2378_v24  ;;  %v260_v60 = vsel %vm175_vm7, %v259_v28, %v2346_v7  ;;  %1581 = vcosq.f32 %v713_v13 }
 0x110   :  { %v1143_v62 = vsub.s32 0, %v1141_v55  ;;  %v2782_v17 = vstv %s1830_s16  ;;  %1583 = vsinq.f32 %v713_v13  ;;  %v288_v35 = vmul.f32 1.442695, %v285_v33  ;;  %s1645_s16 = smov 121  }
 0x111   :  { %v936_v46 = vsel %vm853_vm13, %v935_v43, %v934_v11  ;;  %v511_v40 = vmul.f32 %v2782_v17, %v1994_v51  ;;  %1585 = vpow2.f32 %v62_v2  ;;  %v1133_v20 = vadd.s32 %v2514_v57, %v2520_v32 }
 0x112   :  { %v1471_v25 = vmin.u32 %v1143_v62, %v1141_v55  ;;  %v939_v63 = vsel %vm2580_vm14, %v2384_v9, %v936_v46  ;;  %v262_v7 = vsel %vm2535_vm9, 0, %v260_v60  ;;  %v486_v5 = vsel %vm401_vm8, %v485_v1, %v2378_v24 }
 0x113   :  { %v711_v19 = vsub.s32 4, %v2425_v41  ;;  %1587 = vcosq.f32 %v939_v63  ;;  %v514_v53 = vmul.f32 1.442695, %v511_v40  ;;  %v2783_v6 = vstv %s1879_s21 }
 0x114   :  { %v1145_v50 = vclz %v1471_v25  ;;  %v737_v59 = vmul.f32 %v2783_v6, %v1994_v51  ;;  %1589 = vsinq.f32 %v939_v63  ;;  %v266_v10 = vand.u32 3, %v262_v7 }
 0x115   :  { %1591 = vpow2.f32 %v288_v35  ;;  %v488_v24 = vsel %vm2545_vm10, 0, %v486_v5  ;;  %v712_v21 = vsel %vm627_vm11, %v711_v19, %v2425_v41  ;;  %v937_v61 = vsub.s32 4, %v2477_v30 }
 0x116   :  { %v1472_v29 = vadd.s32 4294967294, %v1145_v50  ;;  %1593 = vpow2.f32 %v514_v53  ;;  %v740_v56 = vmul.f32 1.442695, %v737_v59  ;;  %v714_v39 = vsel %vm2564_vm12, 0, %v712_v21 }
 0x117   :  { %vm267_vm0 = vcmp.lt.s32.totalorder %v266_v10, 2  ;;  %vm268_vm1 = vcmp.eq.s32.totalorder %v266_v10, 0  ;;  %v963_v41 = vmul.f32 %v961_v16, %v1994_v51  ;;  %vm265_vm2 = vweird.f32 %v2012_v38 }
 0x118   :  { %vm1473_vm15 = vcmp.lt.s32.totalorder %v1472_v29, 0  ;;  %v1574_v14 = vpop.eup %1573  ;;  %vm271_vm3 = vcmp.eq.s32.totalorder %v266_v10, 2  ;;  %v938_v43 = vsel %vm853_vm13, %v937_v61, %v2477_v30  ;;  %v718_v2 = vand.u32 3, %v714_v39 }
 0x119   :  { %v1148_v4 = vsel %vm1473_vm15, 0, %v1472_v29  ;;  %v1576_v34 = vpop.eup %1575  ;;  %v272_v23 = vxor.u32 2147483648, %v1574_v14  ;;  %1595 = vpow2.f32 %v740_v56  ;;  %v940_v33 = vsel %vm2580_vm14, 0, %v938_v43 }
 0x11a   :  { %v1149_v15 = vsub.s32 32, %v1148_v4  ;;  %v1150_v22 = vshll.u32 %v1141_v55, %v1148_v4  ;;  %v1153_v8 = vsub.s32 4294967266, %v1148_v4  ;;  %v1578_v11 = vpop.eup %1577  ;;  %v492_v55 = vand.u32 3, %v488_v24 }
 0x11b   :  { %v1580_v12 = vpop.eup %1579  ;;  %v269_v45 = vxor.u32 2147483648, %v1576_v34  ;;  %v498_v25 = vxor.u32 2147483648, %v1578_v11  ;;  %v273_v51 = vsel %vm271_vm3, %v272_v23, %v1576_v34  ;;  %v966_v46 = vmul.f32 1.442695, %v963_v41 }
 0x11c   :  { %v1151_v57 = vshrl.u32 %v1133_v20, %v1149_v15  ;;  %v1154_v32 = vadd.s32 127, %v1153_v8  ;;  %v1582_v28 = vpop.eup %1581  ;;  %v495_v47 = vxor.u32 2147483648, %v1580_v12  ;;  %vm493_vm4 = vcmp.lt.s32.totalorder %v492_v55, 2 }
 0x11d   :  { %v1584_v13 = vpop.eup %1583  ;;  %vm494_vm5 = vcmp.eq.s32.totalorder %v492_v55, 0  ;;  %vm497_vm6 = vcmp.eq.s32.totalorder %v492_v55, 2  ;;  %vm1079_vm7 = vcmp.lt.s32.totalorder %v2449_v3, 0  ;;  %v270_v30 = vsel %vm268_vm1, %v1574_v14, %v269_v45 }
 0x11e   :  { %v1152_v52 = vor.u32 %v1151_v57, %v1150_v22  ;;  %v1155_v48 = vshll.u32 %v1154_v32, 23  ;;  %v1586_v16 = vpop.eup %1585  ;;  %v724_v50 = vxor.u32 2147483648, %v1582_v28  ;;  %vm2628_vm8 = vcmp.le.f32.partialorder %v1077_v18, 0.7853982 }
 0x11f   :  { %v496_v17 = vsel %vm494_vm5, %v1578_v11, %v495_v47  ;;  %v499_v40 = vsel %vm497_vm6, %v498_v25, %v1580_v12  ;;  %v721_v63 = vxor.u32 2147483648, %v1584_v13  ;;  %vm723_vm9 = vcmp.eq.s32.totalorder %v718_v2, 2 }
 0x120   :  { %v1156_v37 = vor.u32 4788187, %v1155_v48  ;;  %v1159_v26 = vcvt.s32.f32 %v1152_v52  ;;  %v1588_v29 = vpop.eup %1587  ;;  %vm491_vm10 = vweird.f32 %v2163_v54  ;;  %vm720_vm11 = vcmp.eq.s32.totalorder %v718_v2, 0 }
 0x121   :  { %v1590_v58 = vpop.eup %1589  ;;  %v944_v35 = vand.u32 3, %v940_v33  ;;  %v274_v7 = vsel %vm267_vm0, %v270_v30, %v273_v51  ;;  %1597 = vpow2.f32 %v966_v46  ;;  %v1163_v5 = vsub.s32 4, %v2541_v31 }
 0x122   :  { %v1157_v62 = vand.u32 2147483647, %v1156_v37  ;;  %v1592_v18 = vpop.eup %1591  ;;  %v500_v4 = vsel %vm493_vm4, %v496_v17, %v499_v40  ;;  %vm719_vm12 = vcmp.lt.s32.totalorder %v718_v2, 2  ;;  %v725_v15 = vsel %vm723_vm9, %v724_v50, %v1584_v13 }
 0x123   :  { %v722_v22 = vsel %vm720_vm11, %v1582_v28, %v721_v63  ;;  %v947_v8 = vxor.u32 2147483648, %v1590_v58  ;;  %v950_v53 = vxor.u32 2147483648, %v1588_v29  ;;  %v1594_v6 = vpop.eup %1593  ;;  %v2786_v59 = vstv %s1843_s17 }
 0x124   :  { %v1160_v44 = vmul.f32 %v1159_v26, %v1157_v62  ;;  %v66_v57 = vmul.f32 %v1586_v16, %v2786_v59  ;;  %v2787_v32 = vstv %s1848_s18  ;;  %vm946_vm13 = vcmp.eq.s32.totalorder %v944_v35, 0 }
 0x125   :  { %v292_v14 = vmul.f32 %v1592_v18, %v2787_v32  ;;  %vm949_vm14 = vcmp.eq.s32.totalorder %v944_v35, 2  ;;  %v275_v10 = vsel %vm265_vm2, nan, %v274_v7  ;;  %v501_v24 = vsel %vm491_vm10, nan, %v500_v4 }
 0x126   :  { %v1161_v60 = vxor.u32 2147483648, %v1160_v44  ;;  %v1164_v21 = vsel %vm1079_vm7, %v1163_v5, %v2541_v31  ;;  %vm717_vm15 = vweird.f32 %v2299_v36  ;;  %v726_v34 = vsel %vm719_vm12, %v722_v22, %v725_v15  ;;  %v1596_v48 = vpop.eup %1595 }
 0x127   :  { %vm945_vm0 = vcmp.lt.s32.totalorder %v944_v35, 2  ;;  %v948_v61 = vsel %vm946_vm13, %v1588_v29, %v947_v8  ;;  %v951_v52 = vsel %vm949_vm14, %v950_v53, %v1590_v58  ;;  %v277_v11 = vmul.f32 %v275_v10, %v66_v57 }
 0x128   :  { %v1162_v20 = vsel %vm1079_vm7, %v1161_v60, %v1160_v44  ;;  %v503_v56 = vmul.f32 %v501_v24, %v292_v14  ;;  %v518_v38 = vmul.f32 %v1594_v6, %v516_v0  ;;  %v1166_v54 = vsel %vm2628_vm8, 0, %v1164_v21 }
 0x129   :  { %v1165_v19 = vsel %vm2628_vm8, %v2449_v3, %v1162_v20  ;;  %v727_v12 = vsel %vm717_vm15, nan, %v726_v34  ;;  %vm943_vm1 = vweird.f32 %v2384_v9  ;;  %v952_v31 = vsel %vm945_vm0, %v948_v61, %v951_v52 }
 0x12a   :  { %1599 = vcosq.f32 %v1165_v19  ;;  %v1170_v36 = vand.u32 3, %v1166_v54  ;;  %v505_v55 = vadd.f32 %v503_v56, %v277_v11  ;;  %v729_v39 = vmul.f32 %v727_v12, %v518_v38 }
 0x12b   :  { %1601 = vsinq.f32 %v1165_v19  ;;  %v2788_v37 = vstv %s1898_s22  ;;  %v953_v23 = vsel %vm943_vm1, nan, %v952_v31  ;;  %vm1169_vm5 = vweird.f32 %v2449_v3 }
 0x12c   :  { %v744_v26 = vmul.f32 %v1596_v48, %v2788_v37  ;;  %vm1175_vm2 = vcmp.eq.s32.totalorder %v1170_v36, 2  ;;  %v731_v62 = vadd.f32 %v729_v39, %v505_v55  ;;  %vm1172_vm3 = vcmp.eq.s32.totalorder %v1170_v36, 0 }
 0x12d   :  { %vm1171_vm4 = vcmp.lt.s32.totalorder %v1170_v36, 2  ;;  %vm37_vm6 = vcmp.ge.s32.totalorder %v1806_v27, 0  ;;  %vm1244_vm7 = vcmask 1040384   ;;  %vm1247_vm8 = vcmask 1041408  }
 0x12e   :  { %v1598_v41 = vpop.eup %1597  ;;  %v955_v0 = vmul.f32 %v953_v23, %v744_v26  ;;  %vm1250_vm9 = vcmask 1042432   ;;  %vm1192_vm10 = vcmask 7168   ;;  %vm1253_vm11 = vcmask 1043456  }
 0x12f   :  { %v970_v9 = vmul.f32 %v1598_v41, %v968_v42  ;;  %vm1256_vm12 = vcmask 1044480   ;;  %vm1259_vm13 = vcmask 1045504   ;;  %vm1262_vm14 = vcmask 1046528  }
 0x130   :  { %v957_v13 = vadd.f32 %v955_v0, %v731_v62  ;;  %vm1200_vm15 = vcmask 15360   ;;  %vm1208_vm0 = vcmask 23552   ;;  %vm1216_vm1 = vcmask 31744  }
 0x137   :  { %v1600_v45 = vpop.eup %1599 }
 0x138   :  { %v1602_v43 = vpop.eup %1601  ;;  %v1176_v28 = vxor.u32 2147483648, %v1600_v45 }
 0x139   :  { %v1173_v47 = vxor.u32 2147483648, %v1602_v43 }
 0x13a   :  { %v1177_v25 = vsel %vm1175_vm2, %v1176_v28, %v1602_v43  ;;  %vm1224_vm2 = vcmask 39936  }
 0x13b   :  { %v1174_v2 = vsel %vm1172_vm3, %v1600_v45, %v1173_v47  ;;  %vm1232_vm3 = vcmask 48128  }
 0x13c   :  { %v1178_v44 = vsel %vm1171_vm4, %v1174_v2, %v1177_v25  ;;  %vm1240_vm4 = vcmask 56320  }
 0x13d   :  { %v1179_v16 = vsel %vm1169_vm5, nan, %v1178_v44  ;;  %vm1278_vm5 = vcmask 72704  }
 0x13e   :  { %v1181_v51 = vmul.f32 %v1179_v16, %v970_v9 }
 0x140   :  { %v1183_v33 = vadd.f32 %v1181_v51, %v957_v13  ;;  %v1189_v42 = vpop.permute.xlu0 %1188  ;;  %v1197_v50 = vpop.permute.xlu1 %1196 }
 0x141   :  { %v1245_v60 = vsel %vm1244_vm7, %v2369_v49, %v1189_v42 }
 0x142   :  { %v1185_v46 = vsel %vm37_vm6, %v1183_v33, 0.0  ;;  %v1248_v29 = vsel %vm1247_vm8, %v1245_v60, %v1197_v50  ;;  %vm1286_vm6 = vcmask 138240  }
 0x143   :  { %1198 = vrot.lane.b32.xlu1 %v1185_v46, %s1624_s25  ;;  %1190 = vrot.lane.b32.xlu0 %v1185_v46, %s1625_s26 }
 0x144   :  { %v1205_v27 = vpop.permute.xlu0 %1204 }
 0x145   :  { %v1251_v63 = vsel %vm1250_vm9, %v1248_v29, %v1205_v27 }
 0x147   :  { %1206 = vrot.lane.b32.xlu1 %v1185_v46, %s1626_s27  ;;  %1236 = vrot.lane.b32.xlu0 %v2369_v49, %s1630_s2 }
 0x148   :  { %v1213_v3 = vpop.permute.xlu0 %1212 }
 0x149   :  { %v1254_v35 = vsel %vm1253_vm11, %v1251_v63, %v1213_v3 }
 0x14b   :  { %1214 = vrot.lane.b32.xlu1 %v1185_v46, %s1627_s28 }
 0x14c   :  { %v1221_v30 = vpop.permute.xlu0 %1220 }
 0x14d   :  { %v1257_v49 = vsel %vm1256_vm12, %v1254_v35, %v1221_v30 }
 0x14f   :  { %1222 = vrot.lane.b32.xlu1 %v1185_v46, %s1628_s29 }
 0x150   :  { %v1229_v1 = vpop.permute.xlu0 %1228 }
 0x151   :  { %v1260_v18 = vsel %vm1259_vm13, %v1257_v49, %v1229_v1 }
 0x153   :  { %1230 = vrot.lane.b32.xlu1 %v1185_v46, %s1629_s30 }
 0x157   :  { %1238 = vrot.lane.b32.xlu1 %v1185_v46, %s1630_s2 }
 0x1b5   :  { %v1199_v17 = vpop.permute.xlu1 %1198  ;;  %v1191_v40 = vpop.permute.xlu0 %1190 }
 0x1b6   :  { %v1193_v58 = vsel %vm1192_vm10, %v1189_v42, %v1191_v40  ;;  %v1201_v4 = vsel %vm1200_vm15, %v1197_v50, %v1199_v17  ;;  %vm1358_vm15 = vcmask 728064  }
 0x1b7   :  { %v1246_v7 = vsel %vm1244_vm7, %v1185_v46, %v1193_v58  ;;  %vm1294_vm7 = vcmask 203776  }
 0x1b8   :  { %v1249_v15 = vsel %vm1247_vm8, %v1246_v7, %v1201_v4  ;;  %vm1302_vm8 = vcmask 269312  }
 0x1b9   :  { %v1207_v20 = vpop.permute.xlu1 %1206  ;;  %v2681_v5 = vpop.permute.xlu0 %1236 }
 0x1ba   :  { %v1263_v19 = vsel %vm1262_vm14, %v1260_v18, %v2681_v5  ;;  %v1209_v8 = vsel %vm1208_vm0, %v1205_v27, %v1207_v20  ;;  %vm1366_vm0 = vcmask 793600  }
 0x1bb   :  { %1267 = vrot.lane.b32.xlu0 %v1263_v19, %s1625_s26  ;;  %v1252_v53 = vsel %vm1250_vm9, %v1249_v15, %v1209_v8  ;;  %vm1310_vm9 = vcmask 334848  }
 0x1bd   :  { %v1215_v22 = vpop.permute.xlu1 %1214 }
 0x1be   :  { %v1217_v6 = vsel %vm1216_vm1, %v1213_v3, %v1215_v22  ;;  %vm1374_vm1 = vcmask 859136  }
 0x1bf   :  { %1274 = vrot.lane.b32.xlu0 %v1263_v19, %s1631_s3  ;;  %v1255_v57 = vsel %vm1253_vm11, %v1252_v53, %v1217_v6  ;;  %vm1326_vm11 = vcmask 465920  }
 0x1c1   :  { %v1223_v59 = vpop.permute.xlu1 %1222 }
 0x1c2   :  { %v1225_v32 = vsel %vm1224_vm2, %v1221_v30, %v1223_v59  ;;  %vm1382_vm2 = vcmask 924672  }
 0x1c3   :  { %1282 = vrot.lane.b32.xlu0 %v1263_v19, %s1632_s4  ;;  %v1258_v10 = vsel %vm1256_vm12, %v1255_v57, %v1225_v32  ;;  %vm1334_vm12 = vcmask 531456  }
 0x1c5   :  { %v1231_v14 = vpop.permute.xlu1 %1230 }
 0x1c6   :  { %v1233_v24 = vsel %vm1232_vm3, %v1229_v1, %v1231_v14  ;;  %vm1392_vm3 = vcmask 990208  }
 0x1c7   :  { %1290 = vrot.lane.b32.xlu0 %v1263_v19, %s1633_s5  ;;  %v1261_v21 = vsel %vm1259_vm13, %v1258_v10, %v1233_v24  ;;  %vm1342_vm13 = vcmask 596992  }
 0x1c8   :  { %v1386_v48 = vsel %vm1262_vm14, %v1261_v21, %v2681_v5 }
 0x1c9   :  { %v1239_v34 = vpop.permute.xlu1 %1238 }
 0x1ca   :  { %v1241_v61 = vsel %vm1240_vm4, %v2681_v5, %v1239_v34 }
 0x1cb   :  { %v1264_v52 = vsel %vm1262_vm14, %v1261_v21, %v1241_v61  ;;  %1298 = vrot.lane.b32.xlu0 %v1263_v19, %s1634_s6  ;;  %vm1350_vm14 = vcmask 662528  }
 0x1cc   :  { %1269 = vrot.lane.b32.xlu1 %v1264_v52, %s1625_s26 }
 0x1cf   :  { %1306 = vrot.lane.b32.xlu0 %v1263_v19, %s1635_s7 }
 0x1d0   :  { %1276 = vrot.lane.b32.xlu1 %v1264_v52, %s1631_s3 }
 0x1d3   :  { %1314 = vrot.lane.b32.xlu0 %v1263_v19, %s1636_s8 }
 0x1d4   :  { %1284 = vrot.lane.b32.xlu1 %v1264_v52, %s1632_s4 }
 0x1d7   :  { %1322 = vrot.lane.b32.xlu0 %v1263_v19, %s1637_s9 }
 0x1d8   :  { %1292 = vrot.lane.b32.xlu1 %v1264_v52, %s1633_s5 }
 0x1db   :  { %1330 = vrot.lane.b32.xlu0 %v1263_v19, %s1638_s10 }
 0x1dc   :  { %1300 = vrot.lane.b32.xlu1 %v1264_v52, %s1634_s6 }
 0x1df   :  { %1338 = vrot.lane.b32.xlu0 %v1263_v19, %s1639_s11 }
 0x1e0   :  { %1308 = vrot.lane.b32.xlu1 %v1264_v52, %s1635_s7 }
 0x1e3   :  { %1346 = vrot.lane.b32.xlu0 %v1263_v19, %s1640_s0 }
 0x1e4   :  { %1316 = vrot.lane.b32.xlu1 %v1264_v52, %s1636_s8 }
 0x1e7   :  { %1354 = vrot.lane.b32.xlu0 %v1263_v19, %s1641_s12 }
 0x1e8   :  { %1324 = vrot.lane.b32.xlu1 %v1264_v52, %s1637_s9 }
 0x1eb   :  { %1362 = vrot.lane.b32.xlu0 %v1263_v19, %s1642_s13 }
 0x1ec   :  { %1332 = vrot.lane.b32.xlu1 %v1264_v52, %s1638_s10 }
 0x1ef   :  { %1370 = vrot.lane.b32.xlu0 %v1263_v19, %s1643_s14 }
 0x1f0   :  { %1340 = vrot.lane.b32.xlu1 %v1264_v52, %s1639_s11 }
 0x1f3   :  { %1378 = vrot.lane.b32.xlu0 %v1263_v19, %s1644_s15 }
 0x1f4   :  { %1348 = vrot.lane.b32.xlu1 %v1264_v52, %s1640_s0 }
 0x1f7   :  { %1388 = vrot.lane.b32.xlu0 %v1263_v19, %s1645_s16 }
 0x1f8   :  { %1356 = vrot.lane.b32.xlu1 %v1264_v52, %s1641_s12 }
 0x1fc   :  { %1364 = vrot.lane.b32.xlu1 %v1264_v52, %s1642_s13 }
 0x200   :  { %1372 = vrot.lane.b32.xlu1 %v1264_v52, %s1643_s14 }
 0x204   :  { %1380 = vrot.lane.b32.xlu1 %v1264_v52, %s1644_s15 }
 0x208   :  { %1390 = vrot.lane.b32.xlu1 %v1386_v48, %s1645_s16 }
 0x22d   :  { %v1268_v11 = vpop.permute.xlu0 %1267 }
 0x231   :  { %v1275_v56 = vpop.permute.xlu0 %1274 }
 0x235   :  { %v1283_v38 = vpop.permute.xlu0 %1282 }
 0x239   :  { %v1291_v54 = vpop.permute.xlu0 %1290 }
 0x23d   :  { %v1299_v12 = vpop.permute.xlu0 %1298 }
 0x23e   :  { %v1270_v31 = vpop.permute.xlu1 %1269 }
 0x23f   :  { %v1271_v36 = vsel %vm1192_vm10, %v1268_v11, %v1270_v31  ;;  %vm1318_vm10 = vcmask 400384  }
 0x240   :  { %1273 = vst [vmem:[%s2746_s1] sm:$0xff] %v1271_v36 }
 0x241   :  { %v1307_v55 = vpop.permute.xlu0 %1306 }
 0x242   :  { %v1277_v39 = vpop.permute.xlu1 %1276 }
 0x243   :  { %v1279_v37 = vsel %vm1278_vm5, %v1275_v56, %v1277_v39 }
 0x244   :  { %1281 = vst [vmem:[%s2746_s1 + $0x8] sm:$0xff] %v1279_v37 }
 0x245   :  { %v1315_v26 = vpop.permute.xlu0 %1314 }
 0x246   :  { %v1285_v23 = vpop.permute.xlu1 %1284 }
 0x247   :  { %v1287_v41 = vsel %vm1286_vm6, %v1283_v38, %v1285_v23 }
 0x248   :  { %1289 = vst [vmem:[%s2746_s1 + $0x10] sm:$0xff] %v1287_v41 }
 0x249   :  { %v1323_v43 = vpop.permute.xlu0 %1322 }
 0x24a   :  { %v1293_v45 = vpop.permute.xlu1 %1292 }
 0x24b   :  { %v1295_v62 = vsel %vm1294_vm7, %v1291_v54, %v1293_v45 }
 0x24c   :  { %1297 = vst [vmem:[%s2746_s1 + $0x18] sm:$0xff] %v1295_v62 }
 0x24d   :  { %v1331_v47 = vpop.permute.xlu0 %1330 }
 0x24e   :  { %v1301_v0 = vpop.permute.xlu1 %1300 }
 0x24f   :  { %v1303_v28 = vsel %vm1302_vm8, %v1299_v12, %v1301_v0 }
 0x250   :  { %1305 = vst [vmem:[%s2746_s1 + $0x20] sm:$0xff] %v1303_v28 }
 0x251   :  { %v1339_v13 = vpop.permute.xlu0 %1338 }
 0x252   :  { %v1309_v9 = vpop.permute.xlu1 %1308 }
 0x253   :  { %v1311_v25 = vsel %vm1310_vm9, %v1307_v55, %v1309_v9 }
 0x254   :  { %1313 = vst [vmem:[%s2746_s1 + $0x28] sm:$0xff] %v1311_v25 }
 0x255   :  { %v1347_v33 = vpop.permute.xlu0 %1346 }
 0x256   :  { %v1317_v2 = vpop.permute.xlu1 %1316 }
 0x257   :  { %v1319_v44 = vsel %vm1318_vm10, %v1315_v26, %v1317_v2 }
 0x258   :  { %1321 = vst [vmem:[%s2746_s1 + $0x30] sm:$0xff] %v1319_v44 }
 0x259   :  { %v1355_v3 = vpop.permute.xlu0 %1354 }
 0x25a   :  { %v1325_v16 = vpop.permute.xlu1 %1324 }
 0x25b   :  { %v1327_v51 = vsel %vm1326_vm11, %v1323_v43, %v1325_v16 }
 0x25c   :  { %1329 = vst [vmem:[%s2746_s1 + $0x38] sm:$0xff] %v1327_v51 }
 0x25d   :  { %v1363_v60 = vpop.permute.xlu0 %1362 }
 0x25e   :  { %v1333_v46 = vpop.permute.xlu1 %1332 }
 0x25f   :  { %v1335_v42 = vsel %vm1334_vm12, %v1331_v47, %v1333_v46 }
 0x260   :  { %1337 = vst [vmem:[%s2746_s1 + $0x40] sm:$0xff] %v1335_v42 }
 0x261   :  { %v1371_v63 = vpop.permute.xlu0 %1370 }
 0x262   :  { %v1341_v27 = vpop.permute.xlu1 %1340 }
 0x263   :  { %v1343_v30 = vsel %vm1342_vm13, %v1339_v13, %v1341_v27 }
 0x264   :  { %1345 = vst [vmem:[%s2746_s1 + $0x48] sm:$0xff] %v1343_v30 }
 0x265   :  { %v1379_v20 = vpop.permute.xlu0 %1378 }
 0x266   :  { %v1349_v50 = vpop.permute.xlu1 %1348 }
 0x267   :  { %v1351_v1 = vsel %vm1350_vm14, %v1347_v33, %v1349_v50 }
 0x268   :  { %1353 = vst [vmem:[%s2746_s1 + $0x50] sm:$0xff] %v1351_v1 }
 0x269   :  { %v1389_v5 = vpop.permute.xlu0 %1388 }
 0x26a   :  { %v1357_v29 = vpop.permute.xlu1 %1356 }
 0x26b   :  { %v1359_v17 = vsel %vm1358_vm15, %v1355_v3, %v1357_v29 }
 0x26c   :  { %1361 = vst [vmem:[%s2746_s1 + $0x58] sm:$0xff] %v1359_v17 }
 0x26e   :  { %v1365_v40 = vpop.permute.xlu1 %1364 }
 0x26f   :  { %v1367_v58 = vsel %vm1366_vm0, %v1363_v60, %v1365_v40 }
 0x270   :  { %1369 = vst [vmem:[%s2746_s1 + $0x60] sm:$0xff] %v1367_v58 }
 0x272   :  { %v1373_v35 = vpop.permute.xlu1 %1372 }
 0x273   :  { %v1375_v49 = vsel %vm1374_vm1, %v1371_v63, %v1373_v35 }
 0x274   :  { %1377 = vst [vmem:[%s2746_s1 + $0x68] sm:$0xff] %v1375_v49 }
 0x276   :  { %v1381_v18 = vpop.permute.xlu1 %1380 }
 0x277   :  { %v1383_v7 = vsel %vm1382_vm2, %v1379_v20, %v1381_v18 }
 0x278   :  { %1385 = vst [vmem:[%s2746_s1 + $0x70] sm:$0xff] %v1383_v7 }
 0x27a   :  { %v1391_v19 = vpop.permute.xlu1 %1390 }
 0x27b   :  { %v1393_v4 = vsel %vm1392_vm3, %v1389_v5, %v1391_v19 }
 0x27c   :  { %1395 = vst [vmem:[%s2746_s1 + $0x78] sm:$0xff] %v1393_v4 }
 0x27d   :  { %1419 = vsyncpa [#allocation3], 1 }

</bundles_post_ra>
